<compile_context>
chip_gen: v7x
topology: tpu7x:2x2x1
jax: 0.10.0
libtpu: 0.0.40
codegen_flags: <defaults>
</compile_context>

<pallas_src>
import functools

import jax
import jax.numpy as jnp
from jax.experimental import pallas as pl
from jax.experimental.pallas import tpu as pltpu

ALPHA = 1.0
BETA = 1.0
POLY_DEGREE = 4
BN_EPS = 1e-5


def _jacobi_basis(t, degree, a=ALPHA, b=BETA):
    """Jacobi polynomials P_0(t)..P_degree(t); recurrence coefficients are trace-time constants."""
    polys = [jnp.ones_like(t)]
    if degree > 0:
        polys.append((a - b + (a + b + 2.0) * t) / 2.0)
    for i in range(2, degree + 1):
        Ai = (2 * i + a + b - 1) * (2 * i + a + b) / (2 * i * (i + a + b))
        Bi = (2 * i + a + b - 1) * (a ** 2 - b ** 2) / (
            2 * i * (i + a + b) * (2 * i + a + b - 2))
        Ci = -2 * (i + a - 1) * (i + b - 1) * (2 * i + a + b) / (
            2 * i * (i + a + b) * (2 * i + a + b - 2))
        polys.append((Ai * t + Bi) * polys[-1] + Ci * polys[-2])
    return polys


def pointnet_kan_kernel(x_ref, w1t_ref, gamma_ref, beta_ref, w2t_ref, o_ref,
                        sum_sc, sumsq_sc, max_sc, min_sc,
                        *, batch, num_points, degree):
    """Fused KANshared + BatchNorm1d(train-mode) + global max-pool + KAN head.

    Grid: (batch, point_tiles), both "arbitrary" (shared BN accumulators).
    Layouts (points on the lane axis):
      x_ref     : (1, C_in, tile_n)         bf16 (current batch / point-tile)
      w1t_ref   : (H, (degree+1)*C_in)      bf16   w1t[o, d*C_in+i] = coeffs1[i, o, d]
      gamma_ref : (H, 1), beta_ref: (H, 1)  f32
      w2t_ref   : (C_out, (degree+1)*H)     f32    w2t[c, d*H+i]   = coeffs2[i, c, d]
      o_ref     : (C_out, batch)            f32    (transposed in the wrapper)
    Scratch: sum/sumsq (H,1) f32; running raw max/min (H, batch) f32.
    """
    b = pl.program_id(0)
    t = pl.program_id(1)
    nb = pl.num_programs(0)
    nt = pl.num_programs(1)

    @pl.when(jnp.logical_and(b == 0, t == 0))
    def _init():
        sum_sc[...] = jnp.zeros_like(sum_sc)
        sumsq_sc[...] = jnp.zeros_like(sumsq_sc)
        max_sc[...] = jnp.full_like(max_sc, -jnp.inf)
        min_sc[...] = jnp.full_like(min_sc, jnp.inf)

    # ---- point-wise KAN (jacobikan5): tanh -> Jacobi basis -> one MXU matmul ----
    xt = jnp.tanh(x_ref[0].astype(jnp.float32))                       # (C_in, tile_n) lane-dense
    jac = jnp.concatenate(_jacobi_basis(xt, degree), axis=0)          # ((D+1)*C_in, tile_n), d-major
    y = jnp.dot(w1t_ref[...], jac.astype(jnp.bfloat16),
                preferred_element_type=jnp.float32)                   # (H, tile_n) f32 accum

    # ---- streamed BN batch stats (single pass: sum and sum-of-squares) ----
    sum_sc[...] += jnp.sum(y, axis=-1, keepdims=True)
    sumsq_sc[...] += jnp.sum(y * y, axis=-1, keepdims=True)

    # ---- raw per-(channel, batch) running max/min; BN affine folded in at finalize ----
    ymax = jnp.max(y, axis=-1, keepdims=True)                         # (H, 1)
    ymin = jnp.min(y, axis=-1, keepdims=True)                         # (H, 1)
    col = jax.lax.broadcasted_iota(jnp.int32, max_sc.shape, 1) == b   # (H, B) lane mask
    max_sc[...] = jnp.where(col, jnp.maximum(max_sc[...], ymax), max_sc[...])
    min_sc[...] = jnp.where(col, jnp.minimum(min_sc[...], ymin), min_sc[...])

    # ---- finalize: BN scale/shift, affine-aware max-pool, KAN head (jacobikan6) ----
    @pl.when(jnp.logical_and(b == nb - 1, t == nt - 1))
    def _finalize():
        inv = 1.0 / float(batch * num_points)
        mean = sum_sc[...] * inv                                       # (H, 1)
        var = jnp.maximum(sumsq_sc[...] * inv - mean * mean, 0.0)      # biased batch var
        scale = gamma_ref[...] * jax.lax.rsqrt(var + BN_EPS)
        shift = beta_ref[...] - mean * scale
        # max over points of (scale*y + shift) = scale*max(y)+shift if scale>=0 else scale*min(y)+shift
        g = jnp.where(scale >= 0.0,
                      scale * max_sc[...] + shift,
                      scale * min_sc[...] + shift)                     # (H, B)
        jac2 = jnp.concatenate(_jacobi_basis(jnp.tanh(g), degree), axis=0)   # ((D+1)*H, B)
        o_ref[...] = jnp.dot(w2t_ref[...], jac2,
                             preferred_element_type=jnp.float32)       # (C_out, B)


def _pick_point_tile(n):
    for cand in (2048, 1024, 512, 256, 128):
        if n % cand == 0:
            return cand
    return n  # full-extent block (valid even when N is not a multiple of 128)


def pointnet_kan_forward(x, coeffs1, coeffs2, gamma, beta, *, degree=POLY_DEGREE):
    B, C_in, N = x.shape
    H = coeffs1.shape[1]
    C_out = coeffs2.shape[1]
    D1 = degree + 1
    tile_n = _pick_point_tile(N)
    num_tiles = N // tile_n

    # Wrapper glue: bf16 cast of x (halves streamed bytes), d-major weight flattening.
    x_b = x.astype(jnp.bfloat16)                                               # (B, C_in, N)
    w1t = jnp.transpose(coeffs1, (1, 2, 0)).reshape(H, D1 * C_in).astype(jnp.bfloat16)
    w2t = jnp.transpose(coeffs2, (1, 2, 0)).reshape(C_out, D1 * H).astype(jnp.float32)
    gamma2 = gamma.reshape(H, 1).astype(jnp.float32)
    beta2 = beta.reshape(H, 1).astype(jnp.float32)

    # VMEM budget: derive from the actual chip (v7x has only 64 MiB/TC).
    try:
        vmem_cap = int(getattr(pltpu.get_tpu_info(), "vmem_capacity_bytes",
                               128 * 1024 * 1024))
    except Exception:
        vmem_cap = 128 * 1024 * 1024
    vmem_limit = min(int(0.75 * vmem_cap), 100 * 1024 * 1024)

    cost = pl.CostEstimate(
        flops=2 * H * D1 * C_in * B * N + 8 * D1 * B * C_in * N + 2 * C_out * D1 * H * B,
        transcendentals=B * C_in * N + H * B,
        bytes_accessed=(x_b.size * 2 + w1t.size * 2
                        + (w2t.size + gamma2.size + beta2.size + C_out * B) * 4),
    )

    out_t = pl.pallas_call(
        functools.partial(pointnet_kan_kernel, batch=B, num_points=N, degree=degree),
        out_shape=jax.ShapeDtypeStruct((C_out, B), jnp.float32),
        grid_spec=pltpu.PrefetchScalarGridSpec(
            num_scalar_prefetch=0,
            grid=(B, num_tiles),
            in_specs=[pl.BlockSpec((1, C_in, tile_n), lambda b, t: (b, 0, t)),
                      pl.BlockSpec((H, D1 * C_in), lambda b, t: (0, 0)),
                      pl.BlockSpec((H, 1), lambda b, t: (0, 0)),
                      pl.BlockSpec((H, 1), lambda b, t: (0, 0)),
                      pl.BlockSpec((C_out, D1 * H), lambda b, t: (0, 0))],
            out_specs=pl.BlockSpec((C_out, B), lambda b, t: (0, 0)),
            scratch_shapes=[pltpu.VMEM((H, 1), jnp.float32),     # sum
                            pltpu.VMEM((H, 1), jnp.float32),     # sum of squares
                            pltpu.VMEM((H, B), jnp.float32),     # running raw max
                            pltpu.VMEM((H, B), jnp.float32)]),   # running raw min
        compiler_params=pltpu.CompilerParams(
            dimension_semantics=("arbitrary", "arbitrary"),
            vmem_limit_bytes=vmem_limit),
        cost_estimate=cost,
    )(x_b, w1t, gamma2, beta2, w2t)
    return out_t.T                                                   # (B, C_out)


def reference(x, coeffs1, coeffs2, gamma, beta, degree=POLY_DEGREE):
    """Pure-JAX reference mirroring the PyTorch forward (training-mode BN)."""
    xt = jnp.tanh(jnp.transpose(x, (0, 2, 1)))             # (B, N, C_in)
    jac = jnp.stack(_jacobi_basis(xt, degree), axis=-1)    # (B, N, C_in, D+1)
    y = jnp.einsum('bnid,iod->bon', jac, coeffs1)          # (B, H, N)
    mean = jnp.mean(y, axis=(0, 2), keepdims=True)
    var = jnp.mean((y - mean) ** 2, axis=(0, 2), keepdims=True)
    yn = (y - mean) / jnp.sqrt(var + BN_EPS) * gamma[None, :, None] + beta[None, :, None]
    g = jnp.max(yn, axis=-1)                               # (B, H)
    t = jnp.tanh(g)
    jac2 = jnp.stack(_jacobi_basis(t, degree), axis=-1)    # (B, H, D+1)
    return jnp.einsum('bid,iod->bo', jac2, coeffs2)


if __name__ == "__main__":
    key = jax.random.PRNGKey(0)
    B, C_in, N = 2, 4, 128
    scaling = 0.125                      # int(1024 * scaling) = 128 hidden channels
    H = int(1024 * scaling)
    C_out = 16
    degree = POLY_DEGREE

    k1, k2, k3 = jax.random.split(key, 3)
    x = jax.random.normal(k1, (B, C_in, N), dtype=jnp.float32)
    # nn.init.normal_(std = 1 / (input_dim * (degree + 1)))
    std1 = 1.0 / (C_in * (degree + 1))
    std2 = 1.0 / (H * (degree + 1))
    coeffs1 = std1 * jax.random.normal(k2, (C_in, H, degree + 1), dtype=jnp.float32)
    coeffs2 = std2 * jax.random.normal(k3, (H, C_out, degree + 1), dtype=jnp.float32)
    gamma = jnp.ones((H,), jnp.float32)   # BatchNorm1d default affine init
    beta = jnp.zeros((H,), jnp.float32)

    out = pointnet_kan_forward(x, coeffs1, coeffs2, gamma, beta)
    out = jax.block_until_ready(out)

    ref = reference(x, coeffs1, coeffs2, gamma, beta)
    assert out.shape == (B, C_out)
    max_err = float(jnp.max(jnp.abs(out - ref)))
    assert jnp.allclose(out, ref, atol=2e-2, rtol=2e-2), max_err
    print("KERNEL_OK")
</pallas_src>

<mosaic_0001>
module attributes {stable_mosaic.version = 11 : i64} {
  func.func @pointnet_kan_kernel(%arg0: i32, %arg1: i32, %arg2: memref<1x4x128xbf16, #tpu.memory_space<vmem>>, %arg3: memref<128x20xbf16, #tpu.memory_space<vmem>>, %arg4: memref<128x1xf32, #tpu.memory_space<vmem>>, %arg5: memref<128x1xf32, #tpu.memory_space<vmem>>, %arg6: memref<16x640xf32, #tpu.memory_space<vmem>>, %arg7: memref<16x2xf32, #tpu.memory_space<vmem>>, %arg8: memref<128x1xf32, #tpu.memory_space<vmem>>, %arg9: memref<128x1xf32, #tpu.memory_space<vmem>>, %arg10: memref<128x2xf32, #tpu.memory_space<vmem>>, %arg11: memref<128x2xf32, #tpu.memory_space<vmem>>) attributes {dimension_semantics = [#tpu.dimension_semantics<arbitrary>, #tpu.dimension_semantics<arbitrary>], iteration_bounds = array<i64: 2, 1>, scalar_prefetch = 0 : i64, scratch_operands = 4 : i64, tpu.core_type = #tpu.core_type<tc>, window_params = [{transform_indices = @transform_0, window_bounds = array<i64: 1, 4, 128>}, {pipeline_mode = #tpu.pipeline_mode<synchronous>, transform_indices = @transform_1, window_bounds = array<i64: 128, 20>}, {pipeline_mode = #tpu.pipeline_mode<synchronous>, transform_indices = @transform_2, window_bounds = array<i64: 128, 1>}, {pipeline_mode = #tpu.pipeline_mode<synchronous>, transform_indices = @transform_3, window_bounds = array<i64: 128, 1>}, {pipeline_mode = #tpu.pipeline_mode<synchronous>, transform_indices = @transform_4, window_bounds = array<i64: 16, 640>}, {pipeline_mode = #tpu.pipeline_mode<synchronous>, transform_indices = @transform_5, window_bounds = array<i64: 16, 2>}]} {
    %c0_i32 = arith.constant 0 : i32
    %0 = arith.cmpi eq, %arg0, %c0_i32 : i32
    %c0_i32_0 = arith.constant 0 : i32
    %1 = arith.cmpi eq, %arg1, %c0_i32_0 : i32
    %2 = arith.andi %0, %1 : i1
    %3 = arith.extui %2 : i1 to i32
    %c0_i32_1 = arith.constant 0 : i32
    %4 = arith.cmpi ne, %3, %c0_i32_1 : i32
    scf.if %4 {
      %cst_45 = arith.constant 0.000000e+00 : f32
      %79 = vector.broadcast %cst_45 : f32 to vector<128x1xf32>
      %c0_46 = arith.constant 0 : index
      %c0_47 = arith.constant 0 : index
      %80 = vector.load %arg8[%c0_46, %c0_47] : memref<128x1xf32, #tpu.memory_space<vmem>>, vector<128x1xf32>
      tpu.vector_store %arg8[%c0_46, %c0_47], %79 {strides = array<i32>} : memref<128x1xf32, #tpu.memory_space<vmem>>, vector<128x1xf32>,
      %cst_48 = arith.constant 0.000000e+00 : f32
      %81 = vector.broadcast %cst_48 : f32 to vector<128x1xf32>
      %c0_49 = arith.constant 0 : index
      %c0_50 = arith.constant 0 : index
      %82 = vector.load %arg9[%c0_49, %c0_50] : memref<128x1xf32, #tpu.memory_space<vmem>>, vector<128x1xf32>
      tpu.vector_store %arg9[%c0_49, %c0_50], %81 {strides = array<i32>} : memref<128x1xf32, #tpu.memory_space<vmem>>, vector<128x1xf32>,
      %cst_51 = arith.constant 0xFF800000 : f32
      %83 = vector.broadcast %cst_51 : f32 to vector<128x2xf32>
      %c0_52 = arith.constant 0 : index
      %c0_53 = arith.constant 0 : index
      %84 = vector.load %arg10[%c0_52, %c0_53] : memref<128x2xf32, #tpu.memory_space<vmem>>, vector<128x2xf32>
      tpu.vector_store %arg10[%c0_52, %c0_53], %83 {strides = array<i32>} : memref<128x2xf32, #tpu.memory_space<vmem>>, vector<128x2xf32>,
      %cst_54 = arith.constant 0x7F800000 : f32
      %85 = vector.broadcast %cst_54 : f32 to vector<128x2xf32>
      %c0_55 = arith.constant 0 : index
      %c0_56 = arith.constant 0 : index
      %86 = vector.load %arg11[%c0_55, %c0_56] : memref<128x2xf32, #tpu.memory_space<vmem>>, vector<128x2xf32>
      tpu.vector_store %arg11[%c0_55, %c0_56], %85 {strides = array<i32>} : memref<128x2xf32, #tpu.memory_space<vmem>>, vector<128x2xf32>,
    } else {
    }
    %c0 = arith.constant 0 : index
    %c0_2 = arith.constant 0 : index
    %c0_3 = arith.constant 0 : index
    %5 = vector.load %arg2[%c0, %c0_2, %c0_3] : memref<1x4x128xbf16, #tpu.memory_space<vmem>>, vector<1x4x128xbf16>
    %6 = vector.shape_cast %5 : vector<1x4x128xbf16> to vector<4x128xbf16>
    %7 = arith.extf %6 : vector<4x128xbf16> to vector<4x128xf32>
    %8 = math.tanh %7 : vector<4x128xf32>
    %cst = arith.constant 1.000000e+00 : f32
    %9 = vector.broadcast %cst : f32 to vector<4x128xf32>
    %cst_4 = arith.constant 4.000000e+00 : f32
    %10 = vector.broadcast %cst_4 : f32 to vector<4x128xf32>
    %11 = arith.mulf %10, %8 : vector<4x128xf32>
    %cst_5 = arith.constant 0.000000e+00 : f32
    %12 = vector.broadcast %cst_5 : f32 to vector<4x128xf32>
    %13 = arith.addf %12, %11 : vector<4x128xf32>
    %cst_6 = arith.constant 2.000000e+00 : f32
    %14 = vector.broadcast %cst_6 : f32 to vector<4x128xf32>
    %15 = arith.divf %13, %14 : vector<4x128xf32>
    %cst_7 = arith.constant 1.875000e+00 : f32
    %16 = vector.broadcast %cst_7 : f32 to vector<4x128xf32>
    %17 = arith.mulf %16, %8 : vector<4x128xf32>
    %cst_8 = arith.constant 0.000000e+00 : f32
    %18 = vector.broadcast %cst_8 : f32 to vector<4x128xf32>
    %19 = arith.addf %17, %18 : vector<4x128xf32>
    %20 = arith.mulf %19, %15 : vector<4x128xf32>
    %cst_9 = arith.constant -7.500000e-01 : f32
    %21 = vector.broadcast %cst_9 : f32 to vector<4x128xf32>
    %22 = arith.mulf %21, %9 : vector<4x128xf32>
    %23 = arith.addf %20, %22 : vector<4x128xf32>
    %cst_10 = arith.constant 1.86666667 : f32
    %24 = vector.broadcast %cst_10 : f32 to vector<4x128xf32>
    %25 = arith.mulf %24, %8 : vector<4x128xf32>
    %cst_11 = arith.constant 0.000000e+00 : f32
    %26 = vector.broadcast %cst_11 : f32 to vector<4x128xf32>
    %27 = arith.addf %25, %26 : vector<4x128xf32>
    %28 = arith.mulf %27, %23 : vector<4x128xf32>
    %cst_12 = arith.constant -8.000000e-01 : f32
    %29 = vector.broadcast %cst_12 : f32 to vector<4x128xf32>
    %30 = arith.mulf %29, %15 : vector<4x128xf32>
    %31 = arith.addf %28, %30 : vector<4x128xf32>
    %cst_13 = arith.constant 1.875000e+00 : f32
    %32 = vector.broadcast %cst_13 : f32 to vector<4x128xf32>
    %33 = arith.mulf %32, %8 : vector<4x128xf32>
    %cst_14 = arith.constant 0.000000e+00 : f32
    %34 = vector.broadcast %cst_14 : f32 to vector<4x128xf32>
    %35 = arith.addf %33, %34 : vector<4x128xf32>
    %36 = arith.mulf %35, %31 : vector<4x128xf32>
    %cst_15 = arith.constant -0.833333313 : f32
    %37 = vector.broadcast %cst_15 : f32 to vector<4x128xf32>
    %38 = arith.mulf %37, %23 : vector<4x128xf32>
    %39 = arith.addf %36, %38 : vector<4x128xf32>
    %40 = tpu.concatenate %9, %15, %23, %31, %39 in 0 : vector<4x128xf32>, vector<4x128xf32>, vector<4x128xf32>, vector<4x128xf32>, vector<4x128xf32> -> vector<20x128xf32>
    %c0_16 = arith.constant 0 : index
    %c0_17 = arith.constant 0 : index
    %41 = vector.load %arg3[%c0_16, %c0_17] : memref<128x20xbf16, #tpu.memory_space<vmem>>, vector<128x20xbf16>
    %42 = arith.truncf %40 : vector<20x128xf32> to vector<20x128xbf16>
    %cst_18 = arith.constant dense<0.000000e+00> : vector<128x128xf32>
    %43 = tpu.matmul %41, %42, %cst_18 {dimension_numbers = #tpu.dot_dimension_numbers<[1], [0], [0], [1], [0, 0, 1, 1], [], []>} : vector<128x20xbf16>, vector<20x128xbf16>, vector<128x128xf32> -> vector<128x128xf32>
    %c0_19 = arith.constant 0 : index
    %c0_20 = arith.constant 0 : index
    %44 = vector.load %arg8[%c0_19, %c0_20] : memref<128x1xf32, #tpu.memory_space<vmem>>, vector<128x1xf32>
    %cst_21 = arith.constant dense<0.000000e+00> : vector<128xf32>
    %45 = vector.multi_reduction <add>, %43, %cst_21 [1] : vector<128x128xf32> to vector<128xf32>
    %46 = vector.shape_cast %45 : vector<128xf32> to vector<128x1xf32>
    %47 = arith.addf %44, %46 : vector<128x1xf32>
    %c0_22 = arith.constant 0 : index
    %c0_23 = arith.constant 0 : index
    %48 = vector.load %arg8[%c0_22, %c0_23] : memref<128x1xf32, #tpu.memory_space<vmem>>, vector<128x1xf32>
    tpu.vector_store %arg8[%c0_22, %c0_23], %47 {strides = array<i32>} : memref<128x1xf32, #tpu.memory_space<vmem>>, vector<128x1xf32>,
    %c0_24 = arith.constant 0 : index
    %c0_25 = arith.constant 0 : index
    %49 = vector.load %arg9[%c0_24, %c0_25] : memref<128x1xf32, #tpu.memory_space<vmem>>, vector<128x1xf32>
    %50 = arith.mulf %43, %43 : vector<128x128xf32>
    %cst_26 = arith.constant dense<0.000000e+00> : vector<128xf32>
    %51 = vector.multi_reduction <add>, %50, %cst_26 [1] : vector<128x128xf32> to vector<128xf32>
    %52 = vector.shape_cast %51 : vector<128xf32> to vector<128x1xf32>
    %53 = arith.addf %49, %52 : vector<128x1xf32>
    %c0_27 = arith.constant 0 : index
    %c0_28 = arith.constant 0 : index
    %54 = vector.load %arg9[%c0_27, %c0_28] : memref<128x1xf32, #tpu.memory_space<vmem>>, vector<128x1xf32>
    tpu.vector_store %arg9[%c0_27, %c0_28], %53 {strides = array<i32>} : memref<128x1xf32, #tpu.memory_space<vmem>>, vector<128x1xf32>,
    %cst_29 = arith.constant dense<0xFF800000> : vector<128xf32>
    %55 = vector.multi_reduction <maximumf>, %43, %cst_29 [1] : vector<128x128xf32> to vector<128xf32>
    %56 = vector.shape_cast %55 : vector<128xf32> to vector<128x1xf32>
    %cst_30 = arith.constant dense<0x7F800000> : vector<128xf32>
    %57 = vector.multi_reduction <minimumf>, %43, %cst_30 [1] : vector<128x128xf32> to vector<128xf32>
    %58 = vector.shape_cast %57 : vector<128xf32> to vector<128x1xf32>
    %59 = tpu.iota {dimensions = array<i32: 1>} : vector<128x2xi32>
    %60 = vector.broadcast %arg0 : i32 to vector<128x2xi32>
    %61 = arith.cmpi eq, %59, %60 : vector<128x2xi32>
    %c0_31 = arith.constant 0 : index
    %c0_32 = arith.constant 0 : index
    %62 = vector.load %arg10[%c0_31, %c0_32] : memref<128x2xf32, #tpu.memory_space<vmem>>, vector<128x2xf32>
    %63 = vector.broadcast %56 : vector<128x1xf32> to vector<128x2xf32>
    %64 = arith.maximumf %62, %63 : vector<128x2xf32>
    %c0_33 = arith.constant 0 : index
    %c0_34 = arith.constant 0 : index
    %65 = vector.load %arg10[%c0_33, %c0_34] : memref<128x2xf32, #tpu.memory_space<vmem>>, vector<128x2xf32>
    %66 = arith.select %61, %64, %65 : vector<128x2xi1>, vector<128x2xf32>
    %c0_35 = arith.constant 0 : index
    %c0_36 = arith.constant 0 : index
    %67 = vector.load %arg10[%c0_35, %c0_36] : memref<128x2xf32, #tpu.memory_space<vmem>>, vector<128x2xf32>
    tpu.vector_store %arg10[%c0_35, %c0_36], %66 {strides = array<i32>} : memref<128x2xf32, #tpu.memory_space<vmem>>, vector<128x2xf32>,
    %c0_37 = arith.constant 0 : index
    %c0_38 = arith.constant 0 : index
    %68 = vector.load %arg11[%c0_37, %c0_38] : memref<128x2xf32, #tpu.memory_space<vmem>>, vector<128x2xf32>
    %69 = vector.broadcast %58 : vector<128x1xf32> to vector<128x2xf32>
    %70 = arith.minimumf %68, %69 : vector<128x2xf32>
    %c0_39 = arith.constant 0 : index
    %c0_40 = arith.constant 0 : index
    %71 = vector.load %arg11[%c0_39, %c0_40] : memref<128x2xf32, #tpu.memory_space<vmem>>, vector<128x2xf32>
    %72 = arith.select %61, %70, %71 : vector<128x2xi1>, vector<128x2xf32>
    %c0_41 = arith.constant 0 : index
    %c0_42 = arith.constant 0 : index
    %73 = vector.load %arg11[%c0_41, %c0_42] : memref<128x2xf32, #tpu.memory_space<vmem>>, vector<128x2xf32>
    tpu.vector_store %arg11[%c0_41, %c0_42], %72 {strides = array<i32>} : memref<128x2xf32, #tpu.memory_space<vmem>>, vector<128x2xf32>,
    %c1_i32 = arith.constant 1 : i32
    %74 = arith.cmpi eq, %arg0, %c1_i32 : i32
    %c0_i32_43 = arith.constant 0 : i32
    %75 = arith.cmpi eq, %arg1, %c0_i32_43 : i32
    %76 = arith.andi %74, %75 : i1
    %77 = arith.extui %76 : i1 to i32
    %c0_i32_44 = arith.constant 0 : i32
    %78 = arith.cmpi ne, %77, %c0_i32_44 : i32
    scf.if %78 {
      %c0_45 = arith.constant 0 : index
      %c0_46 = arith.constant 0 : index
      %79 = vector.load %arg8[%c0_45, %c0_46] : memref<128x1xf32, #tpu.memory_space<vmem>>, vector<128x1xf32>
      %cst_47 = arith.constant 3.906250e-03 : f32
      %80 = vector.broadcast %cst_47 : f32 to vector<128x1xf32>
      %81 = arith.mulf %79, %80 : vector<128x1xf32>
      %c0_48 = arith.constant 0 : index
      %c0_49 = arith.constant 0 : index
      %82 = vector.load %arg9[%c0_48, %c0_49] : memref<128x1xf32, #tpu.memory_space<vmem>>, vector<128x1xf32>
      %cst_50 = arith.constant 3.906250e-03 : f32
      %83 = vector.broadcast %cst_50 : f32 to vector<128x1xf32>
      %84 = arith.mulf %82, %83 : vector<128x1xf32>
      %85 = arith.mulf %81, %81 : vector<128x1xf32>
      %86 = arith.subf %84, %85 : vector<128x1xf32>
      %cst_51 = arith.constant 0.000000e+00 : f32
      %87 = vector.broadcast %cst_51 : f32 to vector<128x1xf32>
      %88 = arith.maximumf %86, %87 : vector<128x1xf32>
      %c0_52 = arith.constant 0 : index
      %c0_53 = arith.constant 0 : index
      %89 = vector.load %arg4[%c0_52, %c0_53] : memref<128x1xf32, #tpu.memory_space<vmem>>, vector<128x1xf32>
      %cst_54 = arith.constant 9.99999974E-6 : f32
      %90 = vector.broadcast %cst_54 : f32 to vector<128x1xf32>
      %91 = arith.addf %88, %90 : vector<128x1xf32>
      %92 = math.rsqrt %91 : vector<128x1xf32>
      %93 = arith.mulf %89, %92 : vector<128x1xf32>
      %c0_55 = arith.constant 0 : index
      %c0_56 = arith.constant 0 : index
      %94 = vector.load %arg5[%c0_55, %c0_56] : memref<128x1xf32, #tpu.memory_space<vmem>>, vector<128x1xf32>
      %95 = arith.mulf %81, %93 : vector<128x1xf32>
      %96 = arith.subf %94, %95 : vector<128x1xf32>
      %cst_57 = arith.constant 0.000000e+00 : f32
      %97 = vector.broadcast %cst_57 : f32 to vector<128x1xf32>
      %98 = arith.cmpf oge, %93, %97 : vector<128x1xf32>
      %c0_58 = arith.constant 0 : index
      %c0_59 = arith.constant 0 : index
      %99 = vector.load %arg10[%c0_58, %c0_59] : memref<128x2xf32, #tpu.memory_space<vmem>>, vector<128x2xf32>
      %100 = vector.broadcast %93 : vector<128x1xf32> to vector<128x2xf32>
      %101 = arith.mulf %100, %99 : vector<128x2xf32>
      %102 = vector.broadcast %96 : vector<128x1xf32> to vector<128x2xf32>
      %103 = arith.addf %101, %102 : vector<128x2xf32>
      %c0_60 = arith.constant 0 : index
      %c0_61 = arith.constant 0 : index
      %104 = vector.load %arg11[%c0_60, %c0_61] : memref<128x2xf32, #tpu.memory_space<vmem>>, vector<128x2xf32>
      %105 = vector.broadcast %93 : vector<128x1xf32> to vector<128x2xf32>
      %106 = arith.mulf %105, %104 : vector<128x2xf32>
      %107 = vector.broadcast %96 : vector<128x1xf32> to vector<128x2xf32>
      %108 = arith.addf %106, %107 : vector<128x2xf32>
      %109 = vector.shape_cast %98 : vector<128x1xi1> to vector<128x1xi1>
      %110 = vector.broadcast %109 : vector<128x1xi1> to vector<128x2xi1>
      %111 = arith.select %110, %103, %108 : vector<128x2xi1>, vector<128x2xf32>
      %112 = math.tanh %111 : vector<128x2xf32>
      %cst_62 = arith.constant 1.000000e+00 : f32
      %113 = vector.broadcast %cst_62 : f32 to vector<128x2xf32>
      %cst_63 = arith.constant 4.000000e+00 : f32
      %114 = vector.broadcast %cst_63 : f32 to vector<128x2xf32>
      %115 = arith.mulf %114, %112 : vector<128x2xf32>
      %cst_64 = arith.constant 0.000000e+00 : f32
      %116 = vector.broadcast %cst_64 : f32 to vector<128x2xf32>
      %117 = arith.addf %116, %115 : vector<128x2xf32>
      %cst_65 = arith.constant 2.000000e+00 : f32
      %118 = vector.broadcast %cst_65 : f32 to vector<128x2xf32>
      %119 = arith.divf %117, %118 : vector<128x2xf32>
      %cst_66 = arith.constant 1.875000e+00 : f32
      %120 = vector.broadcast %cst_66 : f32 to vector<128x2xf32>
      %121 = arith.mulf %120, %112 : vector<128x2xf32>
      %cst_67 = arith.constant 0.000000e+00 : f32
      %122 = vector.broadcast %cst_67 : f32 to vector<128x2xf32>
      %123 = arith.addf %121, %122 : vector<128x2xf32>
      %124 = arith.mulf %123, %119 : vector<128x2xf32>
      %cst_68 = arith.constant -7.500000e-01 : f32
      %125 = vector.broadcast %cst_68 : f32 to vector<128x2xf32>
      %126 = arith.mulf %125, %113 : vector<128x2xf32>
      %127 = arith.addf %124, %126 : vector<128x2xf32>
      %cst_69 = arith.constant 1.86666667 : f32
      %128 = vector.broadcast %cst_69 : f32 to vector<128x2xf32>
      %129 = arith.mulf %128, %112 : vector<128x2xf32>
      %cst_70 = arith.constant 0.000000e+00 : f32
      %130 = vector.broadcast %cst_70 : f32 to vector<128x2xf32>
      %131 = arith.addf %129, %130 : vector<128x2xf32>
      %132 = arith.mulf %131, %127 : vector<128x2xf32>
      %cst_71 = arith.constant -8.000000e-01 : f32
      %133 = vector.broadcast %cst_71 : f32 to vector<128x2xf32>
      %134 = arith.mulf %133, %119 : vector<128x2xf32>
      %135 = arith.addf %132, %134 : vector<128x2xf32>
      %cst_72 = arith.constant 1.875000e+00 : f32
      %136 = vector.broadcast %cst_72 : f32 to vector<128x2xf32>
      %137 = arith.mulf %136, %112 : vector<128x2xf32>
      %cst_73 = arith.constant 0.000000e+00 : f32
      %138 = vector.broadcast %cst_73 : f32 to vector<128x2xf32>
      %139 = arith.addf %137, %138 : vector<128x2xf32>
      %140 = arith.mulf %139, %135 : vector<128x2xf32>
      %cst_74 = arith.constant -0.833333313 : f32
      %141 = vector.broadcast %cst_74 : f32 to vector<128x2xf32>
      %142 = arith.mulf %141, %127 : vector<128x2xf32>
      %143 = arith.addf %140, %142 : vector<128x2xf32>
      %144 = tpu.concatenate %113, %119, %127, %135, %143 in 0 : vector<128x2xf32>, vector<128x2xf32>, vector<128x2xf32>, vector<128x2xf32>, vector<128x2xf32> -> vector<640x2xf32>
      %c0_75 = arith.constant 0 : index
      %c0_76 = arith.constant 0 : index
      %145 = vector.load %arg6[%c0_75, %c0_76] : memref<16x640xf32, #tpu.memory_space<vmem>>, vector<16x640xf32>
      %cst_77 = arith.constant dense<0.000000e+00> : vector<16x2xf32>
      %146 = tpu.matmul %145, %144, %cst_77 {dimension_numbers = #tpu.dot_dimension_numbers<[1], [0], [0], [1], [0, 0, 1, 1], [], []>} : vector<16x640xf32>, vector<640x2xf32>, vector<16x2xf32> -> vector<16x2xf32>
      %c0_78 = arith.constant 0 : index
      %c0_79 = arith.constant 0 : index
      %147 = vector.load %arg7[%c0_78, %c0_79] : memref<16x2xf32, #tpu.memory_space<vmem>>, vector<16x2xf32>
      tpu.vector_store %arg7[%c0_78, %c0_79], %146 {strides = array<i32>} : memref<16x2xf32, #tpu.memory_space<vmem>>, vector<16x2xf32>,
    } else {
    }
    return
  }
  func.func @transform_0(%arg0: i32, %arg1: i32) -> (i32, i32, i32) {
    %c0_i32 = arith.constant 0 : i32
    %c0_i32_0 = arith.constant 0 : i32
    return %arg0, %c0_i32, %arg1 : i32, i32, i32
  }
  func.func @transform_1(%arg0: i32, %arg1: i32) -> (i32, i32) {
    %c0_i32 = arith.constant 0 : i32
    %c0_i32_0 = arith.constant 0 : i32
    %c0_i32_1 = arith.constant 0 : i32
    return %c0_i32, %c0_i32_0 : i32, i32
  }
  func.func @transform_2(%arg0: i32, %arg1: i32) -> (i32, i32) {
    %c0_i32 = arith.constant 0 : i32
    %c0_i32_0 = arith.constant 0 : i32
    %c0_i32_1 = arith.constant 0 : i32
    return %c0_i32, %c0_i32_0 : i32, i32
  }
  func.func @transform_3(%arg0: i32, %arg1: i32) -> (i32, i32) {
    %c0_i32 = arith.constant 0 : i32
    %c0_i32_0 = arith.constant 0 : i32
    %c0_i32_1 = arith.constant 0 : i32
    return %c0_i32, %c0_i32_0 : i32, i32
  }
  func.func @transform_4(%arg0: i32, %arg1: i32) -> (i32, i32) {
    %c0_i32 = arith.constant 0 : i32
    %c0_i32_0 = arith.constant 0 : i32
    %c0_i32_1 = arith.constant 0 : i32
    return %c0_i32, %c0_i32_0 : i32, i32
  }
  func.func @transform_5(%arg0: i32, %arg1: i32) -> (i32, i32) {
    %c0_i32 = arith.constant 0 : i32
    %c0_i32_0 = arith.constant 0 : i32
    %c0_i32_1 = arith.constant 0 : i32
    return %c0_i32, %c0_i32_0 : i32, i32
  }
}

</mosaic_0001>

<bundles_post_ra>
// kernel: tpu_custom_call.1
= control target key start
LH: loop header
LB: loop body
LE: loop exit
PB: predicated region body
PF: predicated region fallthrough
CT: control target
= control target key end

     0   :  { %10 = vsyncpa [#allocation7], 0  ;;  %s3739_s0 = inlined_call_operand.hbm [shape: bf16[2,4,128], index: 0, kind: input, shape index: {}]   ;;  %s3740_s1 = inlined_call_operand.hbm [shape: bf16[128,20], index: 1, kind: input, shape index: {}]   ;;  %s3741_s2 = inlined_call_operand.hbm [shape: f32[128,1], index: 2, kind: input, shape index: {}]   ;;  %s3742_s3 = inlined_call_operand.hbm [shape: f32[128,1], index: 3, kind: input, shape index: {}]   ;;  %s3743_s4 = inlined_call_operand.hbm [shape: f32[16,640], index: 4, kind: input, shape index: {}]   ;;  %s3744_s5 = inlined_call_operand.hbm [shape: f32[16,2], index: 5, kind: output, shape index: {}]  }
   0x1   :  { %12 = vsyncpa [#allocation7 + $0x1], 0 }
   0x2   :  { %13 = vsyncpa [#allocation10], 0 }
   0x3   :  { %14 = vsyncpa [#allocation13], 0 }
   0x4   :  { %15 = vsyncpa [#allocation8], 0  ;;  %s2922_s18 = smov 0   ;;  %s2924_s19 = smov 0  }
   0x5   :  { %s2926_s20 = smov 0   ;;  %s2928_s21 = smov 0  }
   0x6   :  { %s2930_s22 = smov 0   ;;  %s2932_s23 = smov 0  }
   0x7 LB: > { %s3748_s24 = sadd.s32 4294967295, %s2871_s23   ;;  %p2158_p0 = scmp.ge.s32.totalorder %s2871_s23, 1  ;;  %s2871_s23 = sphi %s2932_s23, %s21_s23   ;;  %s2867_s22 = sphi %s2930_s22, %s3767_s22   ;;  %s2863_s21 = sphi %s2928_s21, %s3766_s21   ;;  %s2859_s20 = sphi %s2926_s20, %s3765_s20   ;;  %s2855_s19 = sphi %s2924_s19, %s3764_s19   ;;  %s2851_s18 = sphi %s2922_s18, %s3763_s18  }
   0x8   : > { %p2956_p1 = scmp.eq.s32.totalorder %s3748_s24, 0  ;;  %p171_p2 = scmp.lt.s32.totalorder %s2871_s23, 3 }
   0x9   : > { %s2873_s27 = smov [#allocation9]   ;;  %s2874_s30 = smov [#allocation12]  }
   0xa   : > { %s3749_s25 = scalar_select %p2956_p1, 1, 0 }
   0xb   : > { %p2961_p3 = pnand %p2158_p0, %p171_p2  ;;  %s183_s28 = sshll.u32 %s2873_s27, 4  ;;  %s184_s28 = int_to_ptr.vmem [resolvable:$true] %s183_s28 }
   0xc   : > { %s209_s6 = sshll.u32 %s2874_s30, 4  ;;  %s2641_s9 = scalar_lea.hbm %s3740_s1, 1024  ;;  %s210_s6 = int_to_ptr.vmem [resolvable:$true] %s209_s6 }
   0xd   : > { %s3750_s26 = scalar_select %p2961_p3, 1, 0 }
   0xe   : > { %p2471_p4 = pneg %p2961_p3  ;;  %p2642_p6 = scmp.ne.s32.totalorder %s3740_s1, %s2641_s9 }
   0xf   : > { %p2648_p10 = scmp.lt.u32.totalorder %s2641_s9, %s3740_s1 }
  0x10   : > { %p2969_p5 = pnand %p2471_p4, %p2956_p1 }
  0x12   : > { %p2981_p7 = pneg %p2969_p5 }
  0x14   : > { %p2644_p8 = pnand %p2981_p7, %p2642_p6 }
  0x16   : > { %p2645_p9 = pneg %p2644_p8 }
  0x18   : > { %p2650_p11 = pnand %p2648_p10, %p2645_p9 }
  0x1a   : > { %2653 = shalt.err (!%p2650_p11)
}
  0x1b   : > { %s2654_s15 = scalar_lea.vmem %s184_s28, 1024  ;;  %p2662_p2 = scmp.lt.s32.totalorder %s184_s28, %s184_s28 }
  0x1c   : > { %p2655_p12 = scmp.ne.s32.totalorder %s184_s28, %s2654_s15  ;;  %p2663_p4 = scmp.lt.s32.totalorder %s2654_s15, %s2654_s15 }
  0x1e   : > { %p2657_p13 = pnand %p2655_p12, %p2981_p7  ;;  %p2664_p3 = por %p2663_p4, %p2662_p2 }
  0x20   : > { %p2658_p0 = pneg %p2657_p13 }
  0x22   : > { %p2665_p1 = pnand %p2664_p3, %p2658_p0 }
  0x24   : > { %2668 = shalt.err (!%p2665_p1)
}
  0x25   : > { %s2875_s16 = smov 64   ;;  %s2876_s17 = smov 4  }
  0x26   : > { %2474 = dma.hbm_to_vmem [thread:$0]  (!%p2969_p5), %s3740_s1, 1024, %s184_s28, [#allocation10], %s2875_s16, %s2875_s16, %s2876_s17  }
  0x27   : > { %s2877_s7 = smov [#allocation11]   ;;  %s2669_s11 = scalar_lea.hbm %s3742_s3, 2048 }
  0x28   : > { %s196_s8 = sshll.u32 %s2877_s7, 4  ;;  %p2670_p1 = scmp.ne.s32.totalorder %s3742_s3, %s2669_s11  ;;  %s197_s8 = int_to_ptr.vmem [resolvable:$true] %s196_s8 }
  0x29   : > { %p2676_p8 = scmp.lt.u32.totalorder %s2669_s11, %s3742_s3 }
  0x2a   : > { %p2672_p3 = pnand %p2670_p1, %p2981_p7 }
  0x2c   : > { %p2673_p6 = pneg %p2672_p3 }
  0x2e   : > { %p2678_p9 = pnand %p2676_p8, %p2673_p6 }
  0x30   : > { %2681 = shalt.err (!%p2678_p9)
}
  0x31   : > { %s2682_s28 = scalar_lea.vmem %s210_s6, 2048  ;;  %p2690_p13 = scmp.lt.s32.totalorder %s210_s6, %s210_s6 }
  0x32   : > { %p2683_p10 = scmp.ne.s32.totalorder %s210_s6, %s2682_s28  ;;  %p2691_p0 = scmp.lt.s32.totalorder %s2682_s28, %s2682_s28 }
  0x34   : > { %p2685_p11 = pnand %p2683_p10, %p2981_p7  ;;  %p2692_p2 = por %p2691_p0, %p2690_p13 }
  0x36   : > { %p2686_p12 = pneg %p2685_p11 }
  0x38   : > { %p2693_p4 = pnand %p2692_p2, %p2686_p12 }
  0x3a   : > { %2696 = shalt.err (!%p2693_p4)
}
  0x3b   : > { %s2878_s16 = smov 128   ;;  %s2879_s17 = smov 8  }
  0x3c   : > { %2480 = dma.hbm_to_vmem [thread:$0]  (!%p2969_p5), %s3742_s3, 2048, %s210_s6, [#allocation13], %s2878_s16, %s2878_s16, %s2879_s17  }
  0x3d   : > { %s2697_s9 = scalar_lea.hbm %s3741_s2, 2048 }
  0x3e   : > { %p2698_p1 = scmp.ne.s32.totalorder %s3741_s2, %s2697_s9  ;;  %p2704_p8 = scmp.lt.u32.totalorder %s2697_s9, %s3741_s2 }
  0x40   : > { %p2700_p3 = pnand %p2698_p1, %p2981_p7 }
  0x42   : > { %p2701_p6 = pneg %p2700_p3 }
  0x44   : > { %p2706_p9 = pnand %p2704_p8, %p2701_p6 }
  0x46   : > { %2709 = shalt.err (!%p2706_p9)
}
  0x47   : > { %s2710_s15 = scalar_lea.vmem %s197_s8, 2048  ;;  %p2718_p13 = scmp.lt.s32.totalorder %s197_s8, %s197_s8 }
  0x48   : > { %p2711_p10 = scmp.ne.s32.totalorder %s197_s8, %s2710_s15  ;;  %p2719_p0 = scmp.lt.s32.totalorder %s2710_s15, %s2710_s15 }
  0x4a   : > { %p2713_p11 = pnand %p2711_p10, %p2981_p7  ;;  %p2720_p2 = por %p2719_p0, %p2718_p13 }
  0x4c   : > { %p2714_p12 = pneg %p2713_p11 }
  0x4e   : > { %p2721_p4 = pnand %p2720_p2, %p2714_p12 }
  0x50   : > { %2724 = shalt.err (!%p2721_p4)
}
  0x51   : > { %2477 = dma.hbm_to_vmem [thread:$0]  (!%p2969_p5), %s3741_s2, 2048, %s197_s8, [#allocation10], %s2878_s16, %s2878_s16, %s2879_s17  }
  0x52   : > { %s2880_s24 = smov [#allocation14]   ;;  %s2725_s9 = scalar_lea.hbm %s3743_s4, 1280 }
  0x53   : > { %s222_s27 = sshll.u32 %s2880_s24, 4  ;;  %p2726_p1 = scmp.ne.s32.totalorder %s3743_s4, %s2725_s9  ;;  %s223_s27 = int_to_ptr.vmem [resolvable:$true] %s222_s27 }
  0x54   : > { %p2732_p8 = scmp.lt.u32.totalorder %s2725_s9, %s3743_s4 }
  0x55   : > { %p2728_p3 = pnand %p2726_p1, %p2981_p7 }
  0x57   : > { %p2729_p6 = pneg %p2728_p3 }
  0x59   : > { %p2734_p9 = pnand %p2732_p8, %p2729_p6 }
  0x5b   : > { %2737 = shalt.err (!%p2734_p9)
}
  0x5c   : > { %s2738_s8 = scalar_lea.vmem %s223_s27, 1280  ;;  %p2746_p13 = scmp.lt.s32.totalorder %s223_s27, %s223_s27 }
  0x5d   : > { %p2739_p10 = scmp.ne.s32.totalorder %s223_s27, %s2738_s8  ;;  %p2747_p0 = scmp.lt.s32.totalorder %s2738_s8, %s2738_s8 }
  0x5f   : > { %p2741_p11 = pnand %p2739_p10, %p2981_p7  ;;  %p2748_p2 = por %p2747_p0, %p2746_p13 }
  0x61   : > { %p2742_p12 = pneg %p2741_p11 }
  0x63   : > { %p2749_p4 = pnand %p2748_p2, %p2742_p12 }
  0x65   : > { %2752 = shalt.err (!%p2749_p4)
}
  0x66   : > { %s2881_s16 = smov 640   ;;  %s2882_s12 = smov 40  }
  0x67   : > { %2483 = dma.hbm_to_vmem [thread:$0]  (!%p2969_p5), %s3743_s4, 1280, %s223_s27, [#allocation13], %s2881_s16, %s2881_s16, %s2882_s12  }
  0x68   : > { %s33_s6 = sadd.s32 1, %s2867_s22  ;;  %s42_s28 = sadd.s32 1, %s2859_s20 }
  0x69   : > { %p35_p7 = scmp.ge.s32.totalorder %s33_s6, 2  ;;  %p49_p1 = scmp.ne.s32.totalorder %s2859_s20, %s2855_s19 }
  0x6a   : > { %p50_p3 = scmp.eq.s32.totalorder %s2871_s23, 0  ;;  %p55_p6 = scmp.ne.s32.totalorder %s2855_s19, %s2851_s18 }
  0x6b   : > { %s3769_s6 = smov (%p35_p7, %s33_s6), 0  ;;  %p3754_p9 = scmp.ne.s32.totalorder %s3749_s25, 0 }
  0x6c   : > { %p3060_p8 = por %p50_p3, %p49_p1  ;;  %s37_s27 = ssub.s32 %s2867_s22, %s3769_s6 }
  0x6d   : > { %p3066_p10 = por %p3754_p9, %p55_p6  ;;  %p2492_p5 = scmp.lt.s32.totalorder %s2871_s23, 2 }
  0x6e   : > { %p40_p11 = scmp.eq.s32.totalorder %s37_s27, 0  ;;  %s236_s30 = sand.u32 1, %s2859_s20  }
  0x6f   : > { %s2164_s7 = sshll.u32 %s236_s30, 1  ;;  %s2165_s18 = sshll.u32 %s2867_s22, 5 }
  0x70   : > { %s3075_s9 = scalar_select %p40_p11, %s2859_s20, %s42_s28  }
  0x71   : > { %s3081_s13 = scalar_lea.hbm %s3739_s0, %s2165_s18  ;;  %s240_s14 = scalar_lea.vmem [#allocation6], %s2164_s7 }
  0x72   : > { %s248_s8 = sshll.u32 %s240_s14, 4  ;;  %p3087_p12 = pnand %p2492_p5, %p3060_p8  ;;  %s3083_s8 = int_to_ptr.vmem [resolvable:$true] %s248_s8 }
  0x73   : > { %s237_s12 = scalar_lea.sflag [#allocation7], %s236_s30  ;;  %s2753_s17 = scalar_lea.hbm %s3081_s13, 32 }
  0x74   : > { %p2754_p13 = scmp.ne.s32.totalorder %s3081_s13, %s2753_s17  ;;  %p2755_p0 = pneg %p3087_p12 }
  0x75   : > { %s2758_s27 = scalar_lea.hbm %s3739_s0, 64  ;;  %p2759_p7 = scmp.lt.u32.totalorder %s3081_s13, %s3739_s0 }
  0x76   : > { %p2756_p2 = pnand %p2755_p0, %p2754_p13  ;;  %p2760_p1 = scmp.lt.u32.totalorder %s2758_s27, %s2753_s17 }
  0x77   : > { %p2762_p6 = scmp.lt.u32.totalorder %s2753_s17, %s3081_s13 }
  0x78   : > { %p2757_p4 = pneg %p2756_p2  ;;  %p2761_p3 = por %p2760_p1, %p2759_p7 }
  0x7a   : > { %p2763_p8 = por %p2762_p6, %p2761_p3 }
  0x7c   : > { %p2764_p9 = pnand %p2763_p8, %p2757_p4 }
  0x7e   : > { %2767 = shalt.err (!%p2764_p9)
}
  0x7f   : > { %s2768_s30 = scalar_lea.vmem %s3083_s8, 32  ;;  %s2883_s18 = smov [#allocation6]  }
  0x80   : > { %p2769_p5 = scmp.ne.s32.totalorder %s3083_s8, %s2768_s30  ;;  %s2773_s10 = sshll.u32 %s2883_s18, 4  ;;  %s2774_s10 = int_to_ptr.vmem [resolvable:$false] %s2773_s10 }
  0x81   : > { %s2775_s11 = scalar_lea.vmem %s2774_s10, 64  ;;  %p2776_p2 = scmp.lt.s32.totalorder %s3083_s8, %s2774_s10 }
  0x82   : > { %p2771_p11 = pnand %p2769_p5, %p2755_p0  ;;  %p2777_p7 = scmp.lt.s32.totalorder %s2775_s11, %s2768_s30 }
  0x84   : > { %p2772_p13 = pneg %p2771_p11  ;;  %p2778_p1 = por %p2777_p7, %p2776_p2 }
  0x86   : > { %p2779_p3 = pnand %p2778_p1, %p2772_p13 }
  0x88   : > { %2782 = shalt.err (!%p2779_p3)
}
  0x89   : > { %2487 = dma.hbm_to_vmem [thread:$0]  (!%p3087_p12), %s3081_s13, 32, %s3083_s8, %s237_s12  }
  0x8a   : > { %p3757_p4 = scmp.ne.s32.totalorder %s3750_s26, 0 }
  0x8b   : > { %s259_s14 = sand.u32 (!%p3757_p4), 1, %s2855_s19  }
  0x8c   : > { %257 = sbr.rel (%p3757_p4) target bundleno = 1241 (0x4d9), region = 40  ;;  %s3119_s17 = sshll.u32 (!%p3757_p4), %s259_s14, 1 }
  0x8d   : > { %s260_s15 = scalar_lea.sflag (!%p3757_p4), [#allocation7], %s259_s14  ;;  %s263_s28 = scalar_lea.vmem (!%p3757_p4), [#allocation6], %s3119_s17 }
  0x93   : > { %2834 = dma.done.wait (%p3066_p10), %s260_s15, 32  }
  0x94   : > { %2836 = vsyncadd (%p3066_p10), %s260_s15, 4294967264  ;;  %p3758_p0 = scmp.ne.s32.totalorder %s3749_s25, 0 }
  0x96   : > { %2838 = dma.done.wait (%p3758_p0), [#allocation10], 3072  }
  0x97   : > { %2840 = vsyncadd (%p3758_p0), [#allocation10], 4294964224 }
  0x98   : > { %2842 = dma.done.wait (%p3758_p0), [#allocation13], 3328  }
  0x99   : > { %2844 = vsyncadd (%p3758_p0), [#allocation13], 4294963968  ;;  %p302_p12 = scmp.eq.s32.totalorder %s2863_s21, 0 }
  0x9a   : > { %vm308_vm0 = vcmask (%p302_p12), 7168   ;;  %vm341_vm1 = vcmask (%p302_p12), 15360   ;;  %v2884_v0 = vmov (%p302_p12), 0.0   ;;  %v2885_v1 = vmov (%p302_p12), -inf  }
  0x9b   : > { %307 = sbr.rel (!%p302_p12) target bundleno = 187 (0xbb), region = 64  ;;  %309 = vst.msk [vmem:[#allocation2] sm:$0xff] (%p302_p12), %vm308_vm0, %v2884_v0  ;;  %310 = vst.msk [vmem:[#allocation2 + $0x8] sm:$0xff] (%p302_p12), %vm308_vm0, %v2884_v0  ;;  %v2886_v2 = vmov (%p302_p12), inf  }
  0x9c   : > { %311 = vst.msk [vmem:[#allocation2 + $0x10] sm:$0xff] (%p302_p12), %vm308_vm0, %v2884_v0  ;;  %312 = vst.msk [vmem:[#allocation2 + $0x18] sm:$0xff] (%p302_p12), %vm308_vm0, %v2884_v0 }
  0x9d   : > { %313 = vst.msk [vmem:[#allocation2 + $0x20] sm:$0xff] (%p302_p12), %vm308_vm0, %v2884_v0  ;;  %314 = vst.msk [vmem:[#allocation2 + $0x28] sm:$0xff] (%p302_p12), %vm308_vm0, %v2884_v0 }
  0x9e   : > { %315 = vst.msk [vmem:[#allocation2 + $0x30] sm:$0xff] (%p302_p12), %vm308_vm0, %v2884_v0  ;;  %316 = vst.msk [vmem:[#allocation2 + $0x38] sm:$0xff] (%p302_p12), %vm308_vm0, %v2884_v0 }
  0x9f   : > { %317 = vst.msk [vmem:[#allocation2 + $0x40] sm:$0xff] (%p302_p12), %vm308_vm0, %v2884_v0  ;;  %318 = vst.msk [vmem:[#allocation2 + $0x48] sm:$0xff] (%p302_p12), %vm308_vm0, %v2884_v0 }
  0xa0   : > { %319 = vst.msk [vmem:[#allocation2 + $0x50] sm:$0xff] (%p302_p12), %vm308_vm0, %v2884_v0  ;;  %320 = vst.msk [vmem:[#allocation2 + $0x58] sm:$0xff] (%p302_p12), %vm308_vm0, %v2884_v0 }
  0xa1   : > { %321 = vst.msk [vmem:[#allocation2 + $0x60] sm:$0xff] (%p302_p12), %vm308_vm0, %v2884_v0  ;;  %322 = vst.msk [vmem:[#allocation2 + $0x68] sm:$0xff] (%p302_p12), %vm308_vm0, %v2884_v0 }
  0xa2   : > { %323 = vst.msk [vmem:[#allocation2 + $0x70] sm:$0xff] %vm308_vm0, %v2884_v0  ;;  %324 = vst.msk [vmem:[#allocation2 + $0x78] sm:$0xff] %vm308_vm0, %v2884_v0 }
  0xa3   : > { %325 = vst.msk [vmem:[#allocation3] sm:$0xff] %vm308_vm0, %v2884_v0  ;;  %326 = vst.msk [vmem:[#allocation3 + $0x8] sm:$0xff] %vm308_vm0, %v2884_v0 }
  0xa4   : > { %327 = vst.msk [vmem:[#allocation3 + $0x10] sm:$0xff] %vm308_vm0, %v2884_v0  ;;  %328 = vst.msk [vmem:[#allocation3 + $0x18] sm:$0xff] %vm308_vm0, %v2884_v0 }
  0xa5   : > { %329 = vst.msk [vmem:[#allocation3 + $0x20] sm:$0xff] %vm308_vm0, %v2884_v0  ;;  %330 = vst.msk [vmem:[#allocation3 + $0x28] sm:$0xff] %vm308_vm0, %v2884_v0 }
  0xa6   : > { %331 = vst.msk [vmem:[#allocation3 + $0x30] sm:$0xff] %vm308_vm0, %v2884_v0  ;;  %332 = vst.msk [vmem:[#allocation3 + $0x38] sm:$0xff] %vm308_vm0, %v2884_v0 }
  0xa7   : > { %333 = vst.msk [vmem:[#allocation3 + $0x40] sm:$0xff] %vm308_vm0, %v2884_v0  ;;  %334 = vst.msk [vmem:[#allocation3 + $0x48] sm:$0xff] %vm308_vm0, %v2884_v0 }
  0xa8   : > { %335 = vst.msk [vmem:[#allocation3 + $0x50] sm:$0xff] %vm308_vm0, %v2884_v0  ;;  %336 = vst.msk [vmem:[#allocation3 + $0x58] sm:$0xff] %vm308_vm0, %v2884_v0 }
  0xa9   : > { %337 = vst.msk [vmem:[#allocation3 + $0x60] sm:$0xff] %vm308_vm0, %v2884_v0  ;;  %338 = vst.msk [vmem:[#allocation3 + $0x68] sm:$0xff] %vm308_vm0, %v2884_v0 }
  0xaa   : > { %339 = vst.msk [vmem:[#allocation3 + $0x70] sm:$0xff] %vm308_vm0, %v2884_v0  ;;  %340 = vst.msk [vmem:[#allocation3 + $0x78] sm:$0xff] %vm308_vm0, %v2884_v0 }
  0xab   : > { %342 = vst.msk [vmem:[#allocation4] sm:$0xff] %vm341_vm1, %v2885_v1  ;;  %343 = vst.msk [vmem:[#allocation4 + $0x8] sm:$0xff] %vm341_vm1, %v2885_v1 }
  0xac   : > { %344 = vst.msk [vmem:[#allocation4 + $0x10] sm:$0xff] %vm341_vm1, %v2885_v1  ;;  %345 = vst.msk [vmem:[#allocation4 + $0x18] sm:$0xff] %vm341_vm1, %v2885_v1 }
  0xad   : > { %346 = vst.msk [vmem:[#allocation4 + $0x20] sm:$0xff] %vm341_vm1, %v2885_v1  ;;  %347 = vst.msk [vmem:[#allocation4 + $0x28] sm:$0xff] %vm341_vm1, %v2885_v1 }
  0xae   : > { %348 = vst.msk [vmem:[#allocation4 + $0x30] sm:$0xff] %vm341_vm1, %v2885_v1  ;;  %349 = vst.msk [vmem:[#allocation4 + $0x38] sm:$0xff] %vm341_vm1, %v2885_v1 }
  0xaf   : > { %350 = vst.msk [vmem:[#allocation4 + $0x40] sm:$0xff] %vm341_vm1, %v2885_v1  ;;  %351 = vst.msk [vmem:[#allocation4 + $0x48] sm:$0xff] %vm341_vm1, %v2885_v1 }
  0xb0   : > { %352 = vst.msk [vmem:[#allocation4 + $0x50] sm:$0xff] %vm341_vm1, %v2885_v1  ;;  %353 = vst.msk [vmem:[#allocation4 + $0x58] sm:$0xff] %vm341_vm1, %v2885_v1 }
  0xb1   : > { %354 = vst.msk [vmem:[#allocation4 + $0x60] sm:$0xff] %vm341_vm1, %v2885_v1  ;;  %355 = vst.msk [vmem:[#allocation4 + $0x68] sm:$0xff] %vm341_vm1, %v2885_v1 }
  0xb2   : > { %356 = vst.msk [vmem:[#allocation4 + $0x70] sm:$0xff] %vm341_vm1, %v2885_v1  ;;  %357 = vst.msk [vmem:[#allocation4 + $0x78] sm:$0xff] %vm341_vm1, %v2885_v1 }
  0xb3   : > { %358 = vst.msk [vmem:[#allocation5] sm:$0xff] %vm341_vm1, %v2886_v2  ;;  %359 = vst.msk [vmem:[#allocation5 + $0x8] sm:$0xff] %vm341_vm1, %v2886_v2 }
  0xb4   : > { %360 = vst.msk [vmem:[#allocation5 + $0x10] sm:$0xff] %vm341_vm1, %v2886_v2  ;;  %361 = vst.msk [vmem:[#allocation5 + $0x18] sm:$0xff] %vm341_vm1, %v2886_v2 }
  0xb5   : > { %362 = vst.msk [vmem:[#allocation5 + $0x20] sm:$0xff] %vm341_vm1, %v2886_v2  ;;  %363 = vst.msk [vmem:[#allocation5 + $0x28] sm:$0xff] %vm341_vm1, %v2886_v2 }
  0xb6   : > { %364 = vst.msk [vmem:[#allocation5 + $0x30] sm:$0xff] %vm341_vm1, %v2886_v2  ;;  %365 = vst.msk [vmem:[#allocation5 + $0x38] sm:$0xff] %vm341_vm1, %v2886_v2 }
  0xb7   : > { %366 = vst.msk [vmem:[#allocation5 + $0x40] sm:$0xff] %vm341_vm1, %v2886_v2  ;;  %367 = vst.msk [vmem:[#allocation5 + $0x48] sm:$0xff] %vm341_vm1, %v2886_v2 }
  0xb8   : > { %368 = vst.msk [vmem:[#allocation5 + $0x50] sm:$0xff] %vm341_vm1, %v2886_v2  ;;  %369 = vst.msk [vmem:[#allocation5 + $0x58] sm:$0xff] %vm341_vm1, %v2886_v2 }
  0xb9   : > { %370 = vst.msk [vmem:[#allocation5 + $0x60] sm:$0xff] %vm341_vm1, %v2886_v2  ;;  %371 = vst.msk [vmem:[#allocation5 + $0x68] sm:$0xff] %vm341_vm1, %v2886_v2 }
  0xba   : > { %372 = vst.msk [vmem:[#allocation5 + $0x70] sm:$0xff] %vm341_vm1, %v2886_v2  ;;  %373 = vst.msk [vmem:[#allocation5 + $0x78] sm:$0xff] %vm341_vm1, %v2886_v2 }
  0xbb PF: > { %v374_v3 = vld [vmem:[%s263_s28] sm:$0x3]  ;;  %v2565_v5 = vld [vmem:[#allocation9] sm:$0xff]   ;;  %vm460_vm2 = vcmask 162816   ;;  %vm399_vm3 = vcmask 1043456   ;;  %vm485_vm4 = vcmask 1041408   ;;  %v827_v1 = vlaneseq }
  0xbc   : > { %v375_v4 = vunpack.c.l.bf16 %v374_v3  ;;  %v2566_v6 = vld [vmem:[#allocation9 + $0x20] sm:$0xff]   ;;  %2304 = vmatprep.mubr.msk.bf16.mxu0 %vm460_vm2, %v2565_v5  ;;  %v2567_v27 = vld [vmem:[#allocation9 + $0x8] sm:$0xff]   ;;  %v2569_v29 = vld [vmem:[#allocation9 + $0x10] sm:$0xff]   ;;  %p960_p10 = scmp.eq.s32.totalorder %s2863_s21, 1  ;;  %vm650_vm5 = vcmask 7168   ;;  %vm879_vm7 = vcmask 15360  }
  0xbd   : > { %2312 = vmatprep.mubr.msk.bf16.mxu1 %vm460_vm2, %v2566_v6  ;;  %v2568_v28 = vld [vmem:[#allocation9 + $0x28] sm:$0xff]   ;;  %v2571_v30 = vld [vmem:[#allocation9 + $0x30] sm:$0xff]   ;;  %v2570_v31 = vld [vmem:[#allocation9 + $0x18] sm:$0xff]   ;;  %v828_v6 = vand.u32 127, %v827_v1 }
  0xbe   : > { %2573 = vtanh.f32 %v375_v4  ;;  %v2572_v32 = vld [vmem:[#allocation9 + $0x38] sm:$0xff]   ;;  %v588_v3 = vld [vmem:[#allocation2 + $0x10] sm:$0xff] }
  0xc0   : > { %v596_v2 = vld [vmem:[#allocation2 + $0x50] sm:$0xff] }
  0xc8   : > { %v2574_v7 = vpop.eup %2573 }
  0xc9   : > { %v377_v8 = vmul.f32 4.0, %v2574_v7  ;;  %v381_v9 = vmul.f32 1.875, %v2574_v7  ;;  %v385_v12 = vmul.f32 1.8666667, %v2574_v7 }
  0xcb   : > { %v380_v10 = vmul.f32 0.5, %v377_v8 }
  0xcd   : > { %v383_v11 = vmul.f32 %v381_v9, %v380_v10  ;;  %v388_v14 = vmul.f32 -0.8, %v380_v10  ;;  %v394_v16 = vcombine.low %v380_v10, %v380_v10  ;;  %v833_v10 = vld [vmem:[#allocation4 + $0x10] sm:$0xff] }
  0xcf   : > { %v384_v13 = vadd.f32 -0.75, %v383_v11  ;;  %v400_v20 = vsel %vm399_vm3, 1.0, %v394_v16  ;;  %v586_v11 = vld [vmem:[#allocation2] sm:$0xff] }
  0xd1   : > { %v387_v15 = vmul.f32 %v385_v12, %v384_v13  ;;  %v391_v18 = vmul.f32 -0.8333333, %v384_v13 }
  0xd3   : > { %v389_v17 = vadd.f32 %v388_v14, %v387_v15 }
  0xd5   : > { %v397_v19 = vcombine.low %v389_v17, %v389_v17  ;;  %v390_v21 = vmul.f32 %v389_v17, %v381_v9  ;;  %v829_v9 = vstv %s2863_s21  ;;  %v841_v17 = vld [vmem:[#allocation4 + $0x50] sm:$0xff] }
  0xd6   : > { %vm3255_vm6 = vcmp.eq.s32.totalorder %v828_v6, %v829_v9  ;;  %v587_v6 = vld [vmem:[#allocation2 + $0x8] sm:$0xff] }
  0xd7   : > { %v401_v22 = vsel %vm399_vm3, %v384_v13, %v397_v19  ;;  %v392_v23 = vadd.f32 %v391_v18, %v390_v21  ;;  %v594_v18 = vld [vmem:[#allocation2 + $0x40] sm:$0xff] }
  0xd8   : > { %v418_v24 = vpack.c.bf16 %v401_v22, %v400_v20 }
  0xd9   : > { %v419_v25 = vpack.c.bf16 %v392_v23, %v392_v23 }
  0xda   : > { %2300 = vmatprep.subr.bf16.mxu0 %v418_v24  ;;  %2443 = vmatprep.subr.bf16.mxu1 %v418_v24 }
  0xdb   : > { %2301 = vmatpush3.bf16.msra.mxu0 %v418_v24  ;;  %2445 = vmatpush3.bf16.msra.mxu1 %v418_v24  ;;  %v487_v26 = vsel %vm485_vm4, %v419_v25, 0  ;;  %v898_v24 = vld [vmem:[#allocation5 + $0x10] sm:$0xff] }
  0xdc   : > { %2447 = vmatprep.subr.msk.bf16.mxu0 %vm485_vm4, %v419_v25  ;;  %2448 = vmatprep.subr.msk.bf16.mxu1 %vm485_vm4, %v419_v25  ;;  %v669_v25 = vld [vmem:[#allocation3 + $0x10] sm:$0xff] }
  0xdf   : > { %2303 = vmatpush3.bf16.msra.mxu0 %v487_v26  ;;  %2446 = vmatpush3.bf16.msra.mxu1 %v487_v26 }
  0xe2   : > { %2305 = vmatmul.mubr.msk.bf16.vlgmr.msra.gmra.mrb[0].mxu0 %vm460_vm2, %v2567_v27  ;;  %2313 = vmatmul.mubr.msk.bf16.vlgmr.msra.gmra.mrb[0].mxu1 %vm460_vm2, %v2568_v28 }
  0xe3   : > { %2308 = vmatprep.mubr.msk.bf16.mxu0 %vm460_vm2, %v2569_v29  ;;  %2316 = vmatprep.mubr.msk.bf16.mxu1 %vm460_vm2, %v2571_v30 }
  0xea   : > { %2309 = vmatmul.mubr.msk.bf16.gmra.mrb[4].mxu0 %vm460_vm2, %v2570_v31  ;;  %2317 = vmatmul.mubr.msk.bf16.gmra.mrb[4].mxu1 %vm460_vm2, %v2572_v32  ;;  %v906_v31 = vld [vmem:[#allocation5 + $0x50] sm:$0xff] }
  0xeb   : > { %v677_v32 = vld [vmem:[#allocation3 + $0x50] sm:$0xff] }
 0x1b5   : > { %v2306_v33 = vpop.f32.mrb[0].mxu0  ;;  %v2314_v34 = vpop.f32.mrb[0].mxu1 }
 0x1b6   : > { %622 = vadd.xlane.f32.xlu0 %v2314_v34  ;;  %v555_v35 = vpop.f32.mrb[1].mxu1  ;;  %606 = vadd.xlane.f32.xlu1 %v2306_v33  ;;  %v523_v36 = vpop.f32.mrb[1].mxu0  ;;  %v685_v47 = vmul.f32 %v2306_v33, %v2306_v33  ;;  %v693_v50 = vmul.f32 %v2314_v34, %v2314_v34 }
 0x1b7   : > { %v2307_v37 = vpop.f32.mrb[2].mxu0  ;;  %v2315_v38 = vpop.f32.mrb[2].mxu1  ;;  %v683_v51 = vmul.f32 %v523_v36, %v523_v36  ;;  %v691_v52 = vmul.f32 %v555_v35, %v555_v35 }
 0x1b8   : > { %v526_v39 = vpop.f32.mrb[3].mxu0  ;;  %v558_v40 = vpop.f32.mrb[3].mxu1  ;;  %v686_v53 = vmul.f32 %v2307_v37, %v2307_v37  ;;  %v694_v54 = vmul.f32 %v2315_v38, %v2315_v38 }
 0x1b9   : > { %v684_v55 = vmul.f32 %v526_v39, %v526_v39  ;;  %v692_v56 = vmul.f32 %v558_v40, %v558_v40 }
 0x1ba   : > { %767 = vmax.xlane.f32.xlu1 %v2306_v33  ;;  %602 = vadd.xlane.f32.xlu0 %v523_v36 }
 0x1bd   : > { %v2310_v41 = vpop.f32.mrb[4].mxu0  ;;  %v3209_v42 = vpop.f32.mrb[4].mxu1 }
 0x1be   : > { %783 = vmax.xlane.f32.xlu1 %v2314_v34  ;;  %618 = vadd.xlane.f32.xlu0 %v555_v35  ;;  %v539_v43 = vpop.f32.mrb[5].mxu0  ;;  %v3211_v44 = vpop.f32.mrb[5].mxu1  ;;  %v689_v57 = vmul.f32 %v2310_v41, %v2310_v41  ;;  %v697_v63 = vmul.f32 %v3209_v42, %v3209_v42 }
 0x1bf   : > { %v3213_v45 = vpop.f32.mrb[6].mxu0  ;;  %v3215_v46 = vpop.f32.mrb[6].mxu1  ;;  %v687_v58 = vmul.f32 %v539_v43, %v539_v43  ;;  %v695_v61 = vmul.f32 %v3211_v44, %v3211_v44 }
 0x1c0   : > { %v3217_v48 = vpop.f32.mrb[7].mxu0  ;;  %v3219_v49 = vpop.f32.mrb[7].mxu1  ;;  %v690_v59 = vmul.f32 %v3213_v45, %v3213_v45  ;;  %v698_v0 = vmul.f32 %v3215_v46, %v3215_v46 }
 0x1c1   : > { %v688_v60 = vmul.f32 %v3217_v48, %v3217_v48  ;;  %v696_v62 = vmul.f32 %v3219_v49, %v3219_v49 }
 0x1c2   : > { %799 = vmin.xlane.f32.xlu1 %v2306_v33  ;;  %703 = vadd.xlane.f32.xlu0 %v685_v47 }
 0x1c6   : > { %815 = vmin.xlane.f32.xlu1 %v2314_v34  ;;  %719 = vadd.xlane.f32.xlu0 %v693_v50 }
 0x1ca   : > { %763 = vmax.xlane.f32.xlu1 %v523_v36  ;;  %769 = vmax.xlane.f32.xlu0 %v2307_v37 }
 0x1ce   : > { %779 = vmax.xlane.f32.xlu1 %v555_v35  ;;  %785 = vmax.xlane.f32.xlu0 %v2315_v38 }
 0x1d2   : > { %795 = vmin.xlane.f32.xlu1 %v523_v36  ;;  %801 = vmin.xlane.f32.xlu0 %v2307_v37 }
 0x1d6   : > { %811 = vmin.xlane.f32.xlu1 %v555_v35  ;;  %817 = vmin.xlane.f32.xlu0 %v2315_v38 }
 0x1da   : > { %608 = vadd.xlane.f32.xlu1 %v2307_v37  ;;  %604 = vadd.xlane.f32.xlu0 %v526_v39 }
 0x1de   : > { %624 = vadd.xlane.f32.xlu1 %v2315_v38  ;;  %699 = vadd.xlane.f32.xlu0 %v683_v51  ;;  %v831_v38 = vld [vmem:[#allocation4] sm:$0xff] }
 0x1e2   : > { %620 = vadd.xlane.f32.xlu1 %v558_v40  ;;  %715 = vadd.xlane.f32.xlu0 %v691_v52 }
 0x1e6   : > { %705 = vadd.xlane.f32.xlu1 %v686_v53  ;;  %765 = vmax.xlane.f32.xlu0 %v526_v39  ;;  %v896_v53 = vld [vmem:[#allocation5] sm:$0xff] }
 0x1ea   : > { %721 = vadd.xlane.f32.xlu1 %v694_v54  ;;  %781 = vmax.xlane.f32.xlu0 %v558_v40  ;;  %v899_v54 = vld [vmem:[#allocation5 + $0x18] sm:$0xff] }
 0x1ee   : > { %797 = vmin.xlane.f32.xlu0 %v526_v39  ;;  %701 = vadd.xlane.f32.xlu1 %v684_v55  ;;  %v834_v39 = vld [vmem:[#allocation4 + $0x18] sm:$0xff] }
 0x1f2   : > { %813 = vmin.xlane.f32.xlu0 %v558_v40  ;;  %717 = vadd.xlane.f32.xlu1 %v692_v56 }
 0x1f6   : > { %775 = vmax.xlane.f32.xlu1 %v2310_v41  ;;  %614 = vadd.xlane.f32.xlu0 %v2310_v41 }
 0x1fa   : > { %791 = vmax.xlane.f32.xlu1 %v3209_v42  ;;  %630 = vadd.xlane.f32.xlu0 %v3209_v42 }
 0x1fe   : > { %807 = vmin.xlane.f32.xlu1 %v2310_v41  ;;  %610 = vadd.xlane.f32.xlu0 %v539_v43 }
 0x202   : > { %823 = vmin.xlane.f32.xlu1 %v3209_v42  ;;  %626 = vadd.xlane.f32.xlu0 %v3211_v44 }
 0x206   : > { %771 = vmax.xlane.f32.xlu1 %v539_v43  ;;  %711 = vadd.xlane.f32.xlu0 %v689_v57 }
 0x20a   : > { %787 = vmax.xlane.f32.xlu1 %v3211_v44  ;;  %777 = vmax.xlane.f32.xlu0 %v3213_v45 }
 0x20e   : > { %803 = vmin.xlane.f32.xlu1 %v539_v43  ;;  %793 = vmax.xlane.f32.xlu0 %v3215_v46 }
 0x212   : > { %819 = vmin.xlane.f32.xlu1 %v3211_v44  ;;  %809 = vmin.xlane.f32.xlu0 %v3213_v45 }
 0x216   : > { %825 = vmin.xlane.f32.xlu0 %v3215_v46  ;;  %616 = vadd.xlane.f32.xlu1 %v3213_v45  ;;  %v839_v45 = vld [vmem:[#allocation4 + $0x40] sm:$0xff] }
 0x21a   : > { %707 = vadd.xlane.f32.xlu0 %v687_v58  ;;  %632 = vadd.xlane.f32.xlu1 %v3215_v46  ;;  %v842_v46 = vld [vmem:[#allocation4 + $0x58] sm:$0xff] }
 0x21e   : > { %773 = vmax.xlane.f32.xlu0 %v3217_v48  ;;  %612 = vadd.xlane.f32.xlu1 %v3217_v48 }
 0x222   : > { %789 = vmax.xlane.f32.xlu0 %v3219_v49  ;;  %628 = vadd.xlane.f32.xlu1 %v3219_v49 }
 0x226   : > { %805 = vmin.xlane.f32.xlu0 %v3217_v48  ;;  %713 = vadd.xlane.f32.xlu1 %v690_v59 }
 0x22a   : > { %821 = vmin.xlane.f32.xlu0 %v3219_v49  ;;  %709 = vadd.xlane.f32.xlu1 %v688_v60 }
 0x22e   : > { %723 = vadd.xlane.f32.xlu0 %v695_v61  ;;  %725 = vadd.xlane.f32.xlu1 %v696_v62  ;;  %v904_v61 = vld [vmem:[#allocation5 + $0x40] sm:$0xff]  ;;  %v907_v62 = vld [vmem:[#allocation5 + $0x58] sm:$0xff] }
 0x232   : > { %727 = vadd.xlane.f32.xlu0 %v697_v63  ;;  %729 = vadd.xlane.f32.xlu1 %v698_v0 }
 0x243   : > { %v623_v4 = vpop.xlane.xlu0 %622  ;;  %v607_v5 = vpop.xlane.xlu1 %606 }
 0x244   : > { %v644_v7 = vadd.f32 %v623_v4, %v596_v2  ;;  %v636_v8 = vadd.f32 %v607_v5, %v588_v3  ;;  %v589_v5 = vld [vmem:[#allocation2 + $0x18] sm:$0xff] }
 0x246   : > { %661 = vst.msk [vmem:[#allocation2 + $0x50] sm:$0xff] %vm650_vm5, %v644_v7  ;;  %653 = vst.msk [vmem:[#allocation2 + $0x10] sm:$0xff] %vm650_vm5, %v636_v8 }
 0x247   : > { %v768_v13 = vpop.xlane.xlu1 %767  ;;  %v603_v14 = vpop.xlane.xlu0 %602 }
 0x248   : > { %v849_v15 = vmax.f32 %v833_v10, %v768_v13  ;;  %v634_v16 = vadd.f32 %v603_v14, %v586_v11  ;;  %v597_v14 = vld [vmem:[#allocation2 + $0x58] sm:$0xff] }
 0x24a   : > { %v865_v19 = vsel %vm3255_vm6, %v849_v15, %v833_v10  ;;  %651 = vst.msk [vmem:[#allocation2] sm:$0xff] %vm650_vm5, %v634_v16  ;;  %v667_v15 = vld [vmem:[#allocation3] sm:$0xff] }
 0x24b   : > { %882 = vst.msk [vmem:[#allocation4 + $0x10] sm:$0xff] %vm879_vm7, %v865_v19  ;;  %v784_v20 = vpop.xlane.xlu1 %783  ;;  %v619_v21 = vpop.xlane.xlu0 %618 }
 0x24c   : > { %v857_v22 = vmax.f32 %v841_v17, %v784_v20  ;;  %v642_v23 = vadd.f32 %v619_v21, %v594_v18  ;;  %v595_v20 = vld [vmem:[#allocation2 + $0x48] sm:$0xff]  ;;  %v675_v21 = vld [vmem:[#allocation3 + $0x40] sm:$0xff] }
 0x24e   : > { %v873_v26 = vsel %vm3255_vm6, %v857_v22, %v841_v17  ;;  %659 = vst.msk [vmem:[#allocation2 + $0x40] sm:$0xff] %vm650_vm5, %v642_v23 }
 0x24f   : > { %890 = vst.msk [vmem:[#allocation4 + $0x50] sm:$0xff] %vm879_vm7, %v873_v26  ;;  %v800_v27 = vpop.xlane.xlu1 %799  ;;  %v704_v28 = vpop.xlane.xlu0 %703  ;;  %v670_v26 = vld [vmem:[#allocation3 + $0x18] sm:$0xff] }
 0x250   : > { %v914_v29 = vmin.f32 %v898_v24, %v800_v27  ;;  %v733_v30 = vadd.f32 %v704_v28, %v669_v25  ;;  %v832_v27 = vld [vmem:[#allocation4 + $0x8] sm:$0xff] }
 0x252   : > { %v930_v33 = vsel %vm3255_vm6, %v914_v29, %v898_v24  ;;  %749 = vst.msk [vmem:[#allocation3 + $0x10] sm:$0xff] %vm650_vm5, %v733_v30 }
 0x253   : > { %946 = vst.msk [vmem:[#allocation5 + $0x10] sm:$0xff] %vm879_vm7, %v930_v33  ;;  %v816_v34 = vpop.xlane.xlu1 %815  ;;  %v720_v35 = vpop.xlane.xlu0 %719  ;;  %v840_v33 = vld [vmem:[#allocation4 + $0x48] sm:$0xff] }
 0x254   : > { %v922_v36 = vmin.f32 %v906_v31, %v816_v34  ;;  %v741_v37 = vadd.f32 %v720_v35, %v677_v32  ;;  %v678_v32 = vld [vmem:[#allocation3 + $0x58] sm:$0xff] }
 0x256   : > { %v938_v40 = vsel %vm3255_vm6, %v922_v36, %v906_v31  ;;  %757 = vst.msk [vmem:[#allocation3 + $0x50] sm:$0xff] %vm650_vm5, %v741_v37 }
 0x257   : > { %954 = vst.msk [vmem:[#allocation5 + $0x50] sm:$0xff] %vm879_vm7, %v938_v40  ;;  %v764_v41 = vpop.xlane.xlu1 %763  ;;  %v770_v42 = vpop.xlane.xlu0 %769  ;;  %v668_v40 = vld [vmem:[#allocation3 + $0x8] sm:$0xff] }
 0x258   : > { %v847_v43 = vmax.f32 %v831_v38, %v764_v41  ;;  %v850_v44 = vmax.f32 %v834_v39, %v770_v42 }
 0x25a   : > { %v863_v47 = vsel %vm3255_vm6, %v847_v43, %v831_v38  ;;  %v866_v48 = vsel %vm3255_vm6, %v850_v44, %v834_v39  ;;  %v897_v39 = vld [vmem:[#allocation5 + $0x8] sm:$0xff] }
 0x25b   : > { %880 = vst.msk [vmem:[#allocation4] sm:$0xff] %vm879_vm7, %v863_v47  ;;  %883 = vst.msk [vmem:[#allocation4 + $0x18] sm:$0xff] %vm879_vm7, %v866_v48  ;;  %v780_v49 = vpop.xlane.xlu1 %779  ;;  %v786_v50 = vpop.xlane.xlu0 %785  ;;  %v676_v47 = vld [vmem:[#allocation3 + $0x48] sm:$0xff] }
 0x25c   : > { %v855_v51 = vmax.f32 %v839_v45, %v780_v49  ;;  %v858_v52 = vmax.f32 %v842_v46, %v786_v50 }
 0x25e   : > { %v871_v55 = vsel %vm3255_vm6, %v855_v51, %v839_v45  ;;  %v874_v56 = vsel %vm3255_vm6, %v858_v52, %v842_v46  ;;  %v905_v46 = vld [vmem:[#allocation5 + $0x48] sm:$0xff] }
 0x25f   : > { %888 = vst.msk [vmem:[#allocation4 + $0x40] sm:$0xff] %vm879_vm7, %v871_v55  ;;  %891 = vst.msk [vmem:[#allocation4 + $0x58] sm:$0xff] %vm879_vm7, %v874_v56  ;;  %v796_v57 = vpop.xlane.xlu1 %795  ;;  %v802_v58 = vpop.xlane.xlu0 %801 }
 0x260   : > { %v912_v59 = vmin.f32 %v896_v53, %v796_v57  ;;  %v915_v60 = vmin.f32 %v899_v54, %v802_v58 }
 0x262   : > { %v928_v63 = vsel %vm3255_vm6, %v912_v59, %v896_v53  ;;  %v931_v0 = vsel %vm3255_vm6, %v915_v60, %v899_v54  ;;  %v837_v53 = vld [vmem:[#allocation4 + $0x30] sm:$0xff] }
 0x263   : > { %944 = vst.msk [vmem:[#allocation5] sm:$0xff] %vm879_vm7, %v928_v63  ;;  %947 = vst.msk [vmem:[#allocation5 + $0x18] sm:$0xff] %vm879_vm7, %v931_v0  ;;  %v812_v1 = vpop.xlane.xlu1 %811  ;;  %v818_v2 = vpop.xlane.xlu0 %817  ;;  %v592_v54 = vld [vmem:[#allocation2 + $0x30] sm:$0xff] }
 0x264   : > { %v920_v3 = vmin.f32 %v904_v61, %v812_v1  ;;  %v923_v4 = vmin.f32 %v907_v62, %v818_v2  ;;  %v845_v60 = vld [vmem:[#allocation4 + $0x70] sm:$0xff] }
 0x266   : > { %v936_v7 = vsel %vm3255_vm6, %v920_v3, %v904_v61  ;;  %v939_v8 = vsel %vm3255_vm6, %v923_v4, %v907_v62  ;;  %v600_v61 = vld [vmem:[#allocation2 + $0x70] sm:$0xff]  ;;  %v590_v4 = vld [vmem:[#allocation2 + $0x20] sm:$0xff] }
 0x267   : > { %952 = vst.msk [vmem:[#allocation5 + $0x40] sm:$0xff] %vm879_vm7, %v936_v7  ;;  %955 = vst.msk [vmem:[#allocation5 + $0x58] sm:$0xff] %vm879_vm7, %v939_v8  ;;  %v609_v9 = vpop.xlane.xlu1 %608  ;;  %v605_v10 = vpop.xlane.xlu0 %604  ;;  %v902_v3 = vld [vmem:[#allocation5 + $0x30] sm:$0xff] }
 0x268   : > { %v637_v11 = vadd.f32 %v609_v9, %v589_v5  ;;  %v635_v13 = vadd.f32 %v605_v10, %v587_v6  ;;  %v910_v10 = vld [vmem:[#allocation5 + $0x70] sm:$0xff] }
 0x26a   : > { %654 = vst.msk [vmem:[#allocation2 + $0x18] sm:$0xff] %vm650_vm5, %v637_v11  ;;  %652 = vst.msk [vmem:[#allocation2 + $0x8] sm:$0xff] %vm650_vm5, %v635_v13  ;;  %v598_v11 = vld [vmem:[#allocation2 + $0x60] sm:$0xff] }
 0x26b   : > { %v625_v16 = vpop.xlane.xlu1 %624  ;;  %v700_v17 = vpop.xlane.xlu0 %699 }
 0x26c   : > { %v645_v18 = vadd.f32 %v625_v16, %v597_v14  ;;  %v731_v19 = vadd.f32 %v700_v17, %v667_v15 }
 0x26e   : > { %662 = vst.msk [vmem:[#allocation2 + $0x58] sm:$0xff] %vm650_vm5, %v645_v18  ;;  %747 = vst.msk [vmem:[#allocation3] sm:$0xff] %vm650_vm5, %v731_v19  ;;  %v835_v18 = vld [vmem:[#allocation4 + $0x20] sm:$0xff]  ;;  %v673_v19 = vld [vmem:[#allocation3 + $0x30] sm:$0xff] }
 0x26f   : > { %v621_v22 = vpop.xlane.xlu1 %620  ;;  %v716_v23 = vpop.xlane.xlu0 %715 }
 0x270   : > { %v643_v24 = vadd.f32 %v621_v22, %v595_v20  ;;  %v739_v25 = vadd.f32 %v716_v23, %v675_v21 }
 0x271   : > { %v968_v12 = vld [vmem:[#allocation2 + $0x18] sm:$0xff] (%p960_p10) }
 0x272   : > { %660 = vst.msk [vmem:[#allocation2 + $0x48] sm:$0xff] %vm650_vm5, %v643_v24  ;;  %755 = vst.msk [vmem:[#allocation3 + $0x40] sm:$0xff] %vm650_vm5, %v739_v25  ;;  %v843_v25 = vld [vmem:[#allocation4 + $0x60] sm:$0xff] }
 0x273   : > { %v706_v28 = vpop.xlane.xlu1 %705  ;;  %v766_v29 = vpop.xlane.xlu0 %765 }
 0x274   : > { %v734_v30 = vadd.f32 %v706_v28, %v670_v26  ;;  %v848_v31 = vmax.f32 %v832_v27, %v766_v29  ;;  %v838_v26 = vld [vmem:[#allocation4 + $0x38] sm:$0xff] }
 0x276   : > { %750 = vst.msk [vmem:[#allocation3 + $0x18] sm:$0xff] %vm650_vm5, %v734_v30  ;;  %v864_v34 = vsel %vm3255_vm6, %v848_v31, %v832_v27 }
 0x277   : > { %881 = vst.msk [vmem:[#allocation4 + $0x8] sm:$0xff] %vm879_vm7, %v864_v34  ;;  %v722_v35 = vpop.xlane.xlu1 %721  ;;  %v782_v36 = vpop.xlane.xlu0 %781 }
 0x278   : > { %v742_v37 = vadd.f32 %v722_v35, %v678_v32  ;;  %v856_v38 = vmax.f32 %v840_v33, %v782_v36  ;;  %v900_v32 = vld [vmem:[#allocation5 + $0x20] sm:$0xff] }
 0x27a   : > { %758 = vst.msk [vmem:[#allocation3 + $0x58] sm:$0xff] %vm650_vm5, %v742_v37  ;;  %v872_v41 = vsel %vm3255_vm6, %v856_v38, %v840_v33  ;;  %v846_v33 = vld [vmem:[#allocation4 + $0x78] sm:$0xff] }
 0x27b   : > { %889 = vst.msk [vmem:[#allocation4 + $0x48] sm:$0xff] %vm879_vm7, %v872_v41  ;;  %v798_v42 = vpop.xlane.xlu0 %797  ;;  %v702_v43 = vpop.xlane.xlu1 %701  ;;  %v903_v41 = vld [vmem:[#allocation5 + $0x38] sm:$0xff] }
 0x27c   : > { %v913_v44 = vmin.f32 %v897_v39, %v798_v42  ;;  %v732_v45 = vadd.f32 %v702_v43, %v668_v40  ;;  %v908_v40 = vld [vmem:[#allocation5 + $0x60] sm:$0xff] }
 0x27e   : > { %v929_v48 = vsel %vm3255_vm6, %v913_v44, %v897_v39  ;;  %748 = vst.msk [vmem:[#allocation3 + $0x8] sm:$0xff] %vm650_vm5, %v732_v45 }
 0x27f   : > { %945 = vst.msk [vmem:[#allocation5 + $0x8] sm:$0xff] %vm879_vm7, %v929_v48  ;;  %v814_v49 = vpop.xlane.xlu0 %813  ;;  %v718_v50 = vpop.xlane.xlu1 %717  ;;  %v911_v48 = vld [vmem:[#allocation5 + $0x78] sm:$0xff] }
 0x280   : > { %v921_v51 = vmin.f32 %v905_v46, %v814_v49  ;;  %v740_v52 = vadd.f32 %v718_v50, %v676_v47  ;;  %v593_v49 = vld [vmem:[#allocation2 + $0x38] sm:$0xff] }
 0x282   : > { %v937_v55 = vsel %vm3255_vm6, %v921_v51, %v905_v46  ;;  %756 = vst.msk [vmem:[#allocation3 + $0x48] sm:$0xff] %vm650_vm5, %v740_v52 }
 0x283   : > { %953 = vst.msk [vmem:[#allocation5 + $0x48] sm:$0xff] %vm879_vm7, %v937_v55  ;;  %v776_v56 = vpop.xlane.xlu1 %775  ;;  %v615_v57 = vpop.xlane.xlu0 %614 }
 0x284   : > { %v853_v58 = vmax.f32 %v837_v53, %v776_v56  ;;  %v640_v59 = vadd.f32 %v615_v57, %v592_v54  ;;  %v671_v56 = vld [vmem:[#allocation3 + $0x20] sm:$0xff]  ;;  %v601_v57 = vld [vmem:[#allocation2 + $0x78] sm:$0xff] }
 0x286   : > { %v869_v62 = vsel %vm3255_vm6, %v853_v58, %v837_v53  ;;  %657 = vst.msk [vmem:[#allocation2 + $0x30] sm:$0xff] %vm650_vm5, %v640_v59 }
 0x287   : > { %886 = vst.msk [vmem:[#allocation4 + $0x30] sm:$0xff] %vm879_vm7, %v869_v62  ;;  %v792_v63 = vpop.xlane.xlu1 %791  ;;  %v631_v0 = vpop.xlane.xlu0 %630 }
 0x288   : > { %v861_v1 = vmax.f32 %v845_v60, %v792_v63  ;;  %v648_v2 = vadd.f32 %v631_v0, %v600_v61  ;;  %v836_v63 = vld [vmem:[#allocation4 + $0x28] sm:$0xff] }
 0x289   : > { %v591_v0 = vld [vmem:[#allocation2 + $0x28] sm:$0xff] }
 0x28a   : > { %v877_v5 = vsel %vm3255_vm6, %v861_v1, %v845_v60  ;;  %665 = vst.msk [vmem:[#allocation2 + $0x70] sm:$0xff] %vm650_vm5, %v648_v2 }
 0x28b   : > { %894 = vst.msk [vmem:[#allocation4 + $0x70] sm:$0xff] %vm879_vm7, %v877_v5  ;;  %v808_v6 = vpop.xlane.xlu1 %807  ;;  %v611_v7 = vpop.xlane.xlu0 %610  ;;  %v844_v5 = vld [vmem:[#allocation4 + $0x68] sm:$0xff] }
 0x28c   : > { %v918_v8 = vmin.f32 %v902_v3, %v808_v6  ;;  %v638_v9 = vadd.f32 %v611_v7, %v590_v4  ;;  %v599_v6 = vld [vmem:[#allocation2 + $0x68] sm:$0xff] }
 0x28e   : > { %v934_v13 = vsel %vm3255_vm6, %v918_v8, %v902_v3  ;;  %655 = vst.msk [vmem:[#allocation2 + $0x20] sm:$0xff] %vm650_vm5, %v638_v9 }
 0x28f   : > { %950 = vst.msk [vmem:[#allocation5 + $0x30] sm:$0xff] %vm879_vm7, %v934_v13  ;;  %v824_v14 = vpop.xlane.xlu1 %823  ;;  %v627_v15 = vpop.xlane.xlu0 %626  ;;  %v901_v13 = vld [vmem:[#allocation5 + $0x28] sm:$0xff] }
 0x290   : > { %v926_v16 = vmin.f32 %v910_v10, %v824_v14  ;;  %v646_v17 = vadd.f32 %v627_v15, %v598_v11  ;;  %v674_v14 = vld [vmem:[#allocation3 + $0x38] sm:$0xff] }
 0x292   : > { %v942_v20 = vsel %vm3255_vm6, %v926_v16, %v910_v10  ;;  %663 = vst.msk [vmem:[#allocation2 + $0x60] sm:$0xff] %vm650_vm5, %v646_v17 }
 0x293   : > { %958 = vst.msk [vmem:[#allocation5 + $0x70] sm:$0xff] %vm879_vm7, %v942_v20  ;;  %v772_v21 = vpop.xlane.xlu1 %771  ;;  %v712_v22 = vpop.xlane.xlu0 %711  ;;  %v909_v20 = vld [vmem:[#allocation5 + $0x68] sm:$0xff] }
 0x294   : > { %v851_v23 = vmax.f32 %v835_v18, %v772_v21  ;;  %v737_v24 = vadd.f32 %v712_v22, %v673_v19  ;;  %v672_v21 = vld [vmem:[#allocation3 + $0x28] sm:$0xff] }
 0x296   : > { %v867_v27 = vsel %vm3255_vm6, %v851_v23, %v835_v18  ;;  %753 = vst.msk [vmem:[#allocation3 + $0x30] sm:$0xff] %vm650_vm5, %v737_v24 }
 0x297   : > { %884 = vst.msk [vmem:[#allocation4 + $0x20] sm:$0xff] %vm879_vm7, %v867_v27  ;;  %v788_v28 = vpop.xlane.xlu1 %787  ;;  %v778_v29 = vpop.xlane.xlu0 %777  ;;  %v679_v27 = vld [vmem:[#allocation3 + $0x60] sm:$0xff] }
 0x298   : > { %v859_v30 = vmax.f32 %v843_v25, %v788_v28  ;;  %v854_v31 = vmax.f32 %v838_v26, %v778_v29  ;;  %v680_v28 = vld [vmem:[#allocation3 + $0x68] sm:$0xff] }
 0x29a   : > { %v875_v34 = vsel %vm3255_vm6, %v859_v30, %v843_v25  ;;  %v870_v35 = vsel %vm3255_vm6, %v854_v31, %v838_v26 }
 0x29b   : > { %892 = vst.msk [vmem:[#allocation4 + $0x60] sm:$0xff] %vm879_vm7, %v875_v34  ;;  %887 = vst.msk [vmem:[#allocation4 + $0x38] sm:$0xff] %vm879_vm7, %v870_v35  ;;  %v804_v36 = vpop.xlane.xlu1 %803  ;;  %v794_v37 = vpop.xlane.xlu0 %793  ;;  %v681_v34 = vld [vmem:[#allocation3 + $0x70] sm:$0xff]  ;;  %v682_v35 = vld [vmem:[#allocation3 + $0x78] sm:$0xff] }
 0x29c   : > { %v916_v38 = vmin.f32 %v900_v32, %v804_v36  ;;  %v862_v39 = vmax.f32 %v846_v33, %v794_v37 }
 0x29e   : > { %v932_v42 = vsel %vm3255_vm6, %v916_v38, %v900_v32  ;;  %v878_v43 = vsel %vm3255_vm6, %v862_v39, %v846_v33 }
 0x29f   : > { %948 = vst.msk [vmem:[#allocation5 + $0x20] sm:$0xff] %vm879_vm7, %v932_v42  ;;  %895 = vst.msk [vmem:[#allocation4 + $0x78] sm:$0xff] %vm879_vm7, %v878_v43  ;;  %v820_v44 = vpop.xlane.xlu1 %819  ;;  %v810_v45 = vpop.xlane.xlu0 %809  ;;  %v3389_v42 = vmul.f32 (%p960_p10), 0.00390625, %v968_v12 }
 0x2a0   : > { %v924_v46 = vmin.f32 %v908_v40, %v820_v44  ;;  %v919_v47 = vmin.f32 %v903_v41, %v810_v45  ;;  %v965_v44 = vld [vmem:[#allocation2] sm:$0xff] (%p960_p10) }
 0x2a1   : > { %v997_v45 = vld [vmem:[#allocation3] sm:$0xff] (%p960_p10) }
 0x2a2   : > { %v940_v50 = vsel %vm3255_vm6, %v924_v46, %v908_v40  ;;  %v935_v51 = vsel %vm3255_vm6, %v919_v47, %v903_v41  ;;  %v1000_v40 = vld [vmem:[#allocation3 + $0x18] sm:$0xff] (%p960_p10)  ;;  %v2887_v41 = vmov (%p960_p10), 0   ;;  %v3391_v46 = vmul.f32 (%p960_p10), 0.00390625, %v965_v44 }
 0x2a3   : > { %956 = vst.msk [vmem:[#allocation5 + $0x60] sm:$0xff] %vm879_vm7, %v940_v50  ;;  %951 = vst.msk [vmem:[#allocation5 + $0x38] sm:$0xff] %vm879_vm7, %v935_v51  ;;  %v826_v52 = vpop.xlane.xlu0 %825  ;;  %v617_v53 = vpop.xlane.xlu1 %616  ;;  %2576 = vset.pattern.permute.xlu1 (%p960_p10), %v2887_v41  ;;  %2575 = vset.pattern.permute.xlu0 (%p960_p10), %v2887_v41  ;;  %v1016_v43 = vmul.f32 (%p960_p10), 0.00390625, %v1000_v40  ;;  %v1013_v47 = vmul.f32 (%p960_p10), 0.00390625, %v997_v45  ;;  %v1032_v50 = vmul.f32 (%p960_p10), %v3389_v42, %v3389_v42 }
 0x2a4   : > { %v927_v54 = vmin.f32 %v911_v48, %v826_v52  ;;  %v641_v55 = vadd.f32 %v617_v53, %v593_v49  ;;  %v966_v53 = vld [vmem:[#allocation2 + $0x8] sm:$0xff] (%p960_p10) }
 0x2a6   : > { %v943_v58 = vsel %vm3255_vm6, %v927_v54, %v911_v48  ;;  %658 = vst.msk [vmem:[#allocation2 + $0x38] sm:$0xff] %vm650_vm5, %v641_v55  ;;  %v998_v54 = vld [vmem:[#allocation3 + $0x8] sm:$0xff] (%p960_p10)  ;;  %v1029_v55 = vmul.f32 (%p960_p10), %v3391_v46, %v3391_v46 }
 0x2a7   : > { %959 = vst.msk [vmem:[#allocation5 + $0x78] sm:$0xff] %vm879_vm7, %v943_v58  ;;  %v708_v59 = vpop.xlane.xlu0 %707  ;;  %v633_v60 = vpop.xlane.xlu1 %632  ;;  %v967_v58 = vld [vmem:[#allocation2 + $0x10] sm:$0xff] (%p960_p10) }
 0x2a8   : > { %v735_v61 = vadd.f32 %v708_v59, %v671_v56  ;;  %v649_v62 = vadd.f32 %v633_v60, %v601_v57  ;;  %v3399_v56 = vmul.f32 (%p960_p10), 0.00390625, %v966_v53  ;;  %v1014_v57 = vmul.f32 (%p960_p10), 0.00390625, %v998_v54  ;;  %v999_v59 = vld [vmem:[#allocation3 + $0x10] sm:$0xff] (%p960_p10)  ;;  %v974_v54 = vld [vmem:[#allocation2 + $0x48] sm:$0xff] (%p960_p10) }
 0x2a9   : > { %v1048_v60 = vsub.f32 (%p960_p10), %v1016_v43, %v1032_v50  ;;  %v1079_v50 = vld [vmem:[#allocation11 + $0x10] sm:$0xff] (%p960_p10) }
 0x2aa   : > { %751 = vst.msk [vmem:[#allocation3 + $0x20] sm:$0xff] %vm650_vm5, %v735_v61  ;;  %666 = vst.msk [vmem:[#allocation2 + $0x78] sm:$0xff] %vm650_vm5, %v649_v62  ;;  %v3403_v62 = vmul.f32 (%p960_p10), 0.00390625, %v967_v58  ;;  %v973_v58 = vld [vmem:[#allocation2 + $0x40] sm:$0xff] (%p960_p10) }
 0x2ab   : > { %v774_v1 = vpop.xlane.xlu0 %773  ;;  %v613_v2 = vpop.xlane.xlu1 %612 }
 0x2ac   : > { %v852_v3 = vmax.f32 %v836_v63, %v774_v1  ;;  %v639_v4 = vadd.f32 %v613_v2, %v591_v0  ;;  %v969_v0 = vld [vmem:[#allocation2 + $0x20] sm:$0xff] (%p960_p10)  ;;  %v1045_v2 = vsub.f32 (%p960_p10), %v1013_v47, %v1029_v55 }
 0x2ae   : > { %v868_v7 = vsel %vm3255_vm6, %v852_v3, %v836_v63  ;;  %656 = vst.msk [vmem:[#allocation2 + $0x28] sm:$0xff] %vm650_vm5, %v639_v4  ;;  %v1015_v63 = vmul.f32 (%p960_p10), 0.00390625, %v999_v59  ;;  %v1030_v3 = vmul.f32 (%p960_p10), %v3399_v56, %v3399_v56  ;;  %v3407_v4 = vmul.f32 (%p960_p10), 0.00390625, %v969_v0 }
 0x2af   : > { %885 = vst.msk [vmem:[#allocation4 + $0x28] sm:$0xff] %vm879_vm7, %v868_v7  ;;  %v790_v8 = vpop.xlane.xlu0 %789  ;;  %v629_v9 = vpop.xlane.xlu1 %628  ;;  %v3425_v0 = vmul.f32 (%p960_p10), 0.00390625, %v974_v54 }
 0x2b0   : > { %v860_v10 = vmax.f32 %v844_v5, %v790_v8  ;;  %v647_v11 = vadd.f32 %v629_v9, %v599_v6  ;;  %v1064_v6 = vmax.f32 (%p960_p10), %v1048_v60, 0.0  ;;  %v1031_v8 = vmul.f32 (%p960_p10), %v3403_v62, %v3403_v62  ;;  %v1081_v60 = vld [vmem:[#allocation11 + $0x20] sm:$0xff] (%p960_p10) }
 0x2b1   : > { %v1001_v1 = vld [vmem:[#allocation3 + $0x20] sm:$0xff] (%p960_p10)  ;;  %v1061_v9 = vmax.f32 (%p960_p10), %v1045_v2, 0.0 }
 0x2b2   : > { %v876_v15 = vsel %vm3255_vm6, %v860_v10, %v844_v5  ;;  %664 = vst.msk [vmem:[#allocation2 + $0x68] sm:$0xff] %vm650_vm5, %v647_v11  ;;  %v1017_v5 = vmul.f32 (%p960_p10), 0.00390625, %v1001_v1  ;;  %v1046_v10 = vsub.f32 (%p960_p10), %v1014_v57, %v1030_v3  ;;  %v1033_v11 = vmul.f32 (%p960_p10), %v3407_v4, %v3407_v4 }
 0x2b3   : > { %893 = vst.msk [vmem:[#allocation4 + $0x68] sm:$0xff] %vm879_vm7, %v876_v15  ;;  %v806_v16 = vpop.xlane.xlu0 %805  ;;  %v714_v17 = vpop.xlane.xlu1 %713  ;;  %v1047_v15 = vsub.f32 (%p960_p10), %v1015_v63, %v1031_v8  ;;  %v1005_v63 = vld [vmem:[#allocation3 + $0x40] sm:$0xff] (%p960_p10)  ;;  %v3428_v3 = vmul.f32 (%p960_p10), 0.00390625, %v973_v58 }
 0x2b4   : > { %v917_v18 = vmin.f32 %v901_v13, %v806_v16  ;;  %v738_v19 = vadd.f32 %v714_v17, %v674_v14  ;;  %v1093_v16 = vadd.f32 (%p960_p10), 1e-05, %v1061_v9  ;;  %v1062_v17 = vmax.f32 (%p960_p10), %v1046_v10, 0.0  ;;  %v1141_v8 = vld [vmem:[#allocation12] sm:$0xff] (%p960_p10) }
 0x2b5   : > { %v970_v48 = vld [vmem:[#allocation2 + $0x28] sm:$0xff] (%p960_p10)  ;;  %v1021_v9 = vmul.f32 (%p960_p10), 0.00390625, %v1005_v63 }
 0x2b6   : > { %v933_v22 = vsel %vm3255_vm6, %v917_v18, %v901_v13  ;;  %754 = vst.msk [vmem:[#allocation3 + $0x38] sm:$0xff] %vm650_vm5, %v738_v19  ;;  %v3395_v51 = vmul.f32 (%p960_p10), 0.00390625, %v970_v48  ;;  %v1096_v13 = vadd.f32 (%p960_p10), 1e-05, %v1064_v6  ;;  %v1049_v18 = vsub.f32 (%p960_p10), %v1017_v5, %v1033_v11  ;;  %v1006_v5 = vld [vmem:[#allocation3 + $0x48] sm:$0xff] (%p960_p10) }
 0x2b7   : > { %949 = vst.msk [vmem:[#allocation5 + $0x28] sm:$0xff] %vm879_vm7, %v933_v22  ;;  %v822_v23 = vpop.xlane.xlu0 %821  ;;  %v710_v24 = vpop.xlane.xlu1 %709  ;;  %v1022_v11 = vmul.f32 (%p960_p10), 0.00390625, %v1006_v5 }
 0x2b8   : > { %v925_v25 = vmin.f32 %v909_v20, %v822_v23  ;;  %v736_v26 = vadd.f32 %v710_v24, %v672_v21  ;;  %v1034_v61 = vmul.f32 (%p960_p10), %v3395_v51, %v3395_v51  ;;  %2577 = vrsqrt.f32 (%p960_p10), %v1096_v13 }
 0x2b9   : > { %2579 = vrsqrt.f32 (%p960_p10), %v1093_v16  ;;  %v1094_v21 = vadd.f32 (%p960_p10), 1e-05, %v1062_v17  ;;  %v1065_v22 = vmax.f32 (%p960_p10), %v1049_v18, 0.0  ;;  %v1038_v13 = vmul.f32 (%p960_p10), %v3425_v0, %v3425_v0  ;;  %v1142_v17 = vld [vmem:[#allocation12 + $0x8] sm:$0xff] (%p960_p10) }
 0x2ba   : > { %v941_v29 = vsel %vm3255_vm6, %v925_v25, %v909_v20  ;;  %752 = vst.msk [vmem:[#allocation3 + $0x28] sm:$0xff] %vm650_vm5, %v736_v26  ;;  %v1063_v20 = vmax.f32 (%p960_p10), %v1047_v15, 0.0  ;;  %v972_v25 = vld [vmem:[#allocation2 + $0x38] sm:$0xff] (%p960_p10)  ;;  %v971_v26 = vld [vmem:[#allocation2 + $0x30] sm:$0xff] (%p960_p10)  ;;  %v1037_v16 = vmul.f32 (%p960_p10), %v3428_v3, %v3428_v3  ;;  %v978_v58 = vld [vmem:[#allocation2 + $0x68] sm:$0xff] (%p960_p10) }
 0x2bb   : > { %957 = vst.msk [vmem:[#allocation5 + $0x68] sm:$0xff] %vm879_vm7, %v941_v29  ;;  %v724_v30 = vpop.xlane.xlu0 %723  ;;  %v726_v31 = vpop.xlane.xlu1 %725  ;;  %v1097_v24 = vadd.f32 (%p960_p10), 1e-05, %v1065_v22  ;;  %v1077_v29 = vld [vmem:[#allocation11] sm:$0xff] (%p960_p10) }
 0x2bc   : > { %v743_v32 = vadd.f32 %v724_v30, %v679_v27  ;;  %v744_v33 = vadd.f32 %v726_v31, %v680_v28  ;;  %964 = sbr.rel (!%p960_p10) target bundleno = 1215 (0x4bf), region = 68  ;;  %v1095_v23 = vadd.f32 (%p960_p10), 1e-05, %v1063_v20  ;;  %v1080_v27 = vld [vmem:[#allocation11 + $0x18] sm:$0xff] (%p960_p10)  ;;  %v3413_v28 = vmul.f32 (%p960_p10), 0.00390625, %v972_v25  ;;  %v975_v25 = vld [vmem:[#allocation2 + $0x50] sm:$0xff] (%p960_p10) }
 0x2bd   : > { %v3415_v30 = vmul.f32 (%p960_p10), 0.00390625, %v971_v26  ;;  %v1004_v31 = vld [vmem:[#allocation3 + $0x38] sm:$0xff] (%p960_p10)  ;;  %v1053_v22 = vsub.f32 (%p960_p10), %v1021_v9, %v1037_v16 }
 0x2be   : > { %759 = vst.msk [vmem:[#allocation3 + $0x60] sm:$0xff] %vm650_vm5, %v743_v32  ;;  %760 = vst.msk [vmem:[#allocation3 + $0x68] sm:$0xff] %vm650_vm5, %v744_v33  ;;  %v1082_v33 = vld [vmem:[#allocation11 + $0x28] sm:$0xff] (%p960_p10)  ;;  %v1020_v12 = vmul.f32 (%p960_p10), 0.00390625, %v1004_v31  ;;  %v1036_v40 = vmul.f32 (%p960_p10), %v3413_v28, %v3413_v28  ;;  %v1148_v9 = vld [vmem:[#allocation12 + $0x38] sm:$0xff] (%p960_p10) }
 0x2bf   : > { %v728_v36 = vpop.xlane.xlu0 %727  ;;  %v730_v37 = vpop.xlane.xlu1 %729  ;;  %v1035_v47 = vmul.f32 (%p960_p10), %v3415_v30, %v3415_v30 }
 0x2c0   : > { %v745_v38 = vadd.f32 %v728_v36, %v681_v34  ;;  %v746_v39 = vadd.f32 %v730_v37, %v682_v35  ;;  %v1003_v34 = vld [vmem:[#allocation3 + $0x30] sm:$0xff] (%p960_p10) }
 0x2c1   : > { %v1002_v49 = vld [vmem:[#allocation3 + $0x28] sm:$0xff] (%p960_p10)  ;;  %v1019_v45 = vmul.f32 (%p960_p10), 0.00390625, %v1003_v34  ;;  %v3447_v34 = vmul.f32 (%p960_p10), 0.00390625, %v975_v25 }
 0x2c2   : > { %761 = vst.msk [vmem:[#allocation3 + $0x70] sm:$0xff] %vm650_vm5, %v745_v38  ;;  %762 = vst.msk [vmem:[#allocation3 + $0x78] sm:$0xff] %vm650_vm5, %v746_v39  ;;  %v1018_v52 = vmul.f32 (%p960_p10), 0.00390625, %v1002_v49  ;;  %v2578_v32 = vpop.eup (%p960_p10), %2577  ;;  %v1078_v37 = vld [vmem:[#allocation11 + $0x8] sm:$0xff] (%p960_p10) }
 0x2c3   : > { %v2580_v35 = vpop.eup %2579  ;;  %v1128_v36 = vmul.f32 %v2578_v32, %v1080_v27  ;;  %v1051_v53 = vsub.f32 %v1019_v45, %v1035_v47  ;;  %v1143_v27 = vld [vmem:[#allocation12 + $0x10] sm:$0xff] }
 0x2c4   : > { %v1050_v7 = vsub.f32 %v1018_v52, %v1034_v61  ;;  %v1125_v39 = vmul.f32 %v2580_v35, %v1077_v29  ;;  %v1052_v52 = vsub.f32 %v1020_v12, %v1036_v40  ;;  %v1008_v35 = vld [vmem:[#allocation3 + $0x58] sm:$0xff] }
 0x2c5   : > { %1238 = vperm.xlu1 %2576, %v1128_v36   ;;  %vm1192_vm9 = vcmp.ge.f32.partialorder %v1128_v36, 0.0  ;;  %v1067_v2 = vmax.f32 %v1051_v53, 0.0  ;;  %v1024_v40 = vmul.f32 0.00390625, %v1008_v35  ;;  %v1083_v53 = vld [vmem:[#allocation11 + $0x30] sm:$0xff] }
 0x2c6   : > { %v1066_v14 = vmax.f32 %v1050_v7, 0.0  ;;  %1223 = vperm.xlu0 %2575, %v1125_v39   ;;  %v1068_v61 = vmax.f32 %v1052_v52, 0.0  ;;  %v1157_v1 = vmul.f32 %v1125_v39, %v3391_v46  ;;  %v1464_v6 = vsel %vm1192_vm9, 1, %v2887_v41  ;;  %v1084_v52 = vld [vmem:[#allocation11 + $0x38] sm:$0xff] }
 0x2c7   : > { %vm1189_vm10 = vcmp.ge.f32.partialorder %v1125_v39, 0.0  ;;  %v1099_v15 = vadd.f32 1e-05, %v1067_v2  ;;  %v1145_v39 = vld [vmem:[#allocation12 + $0x20] sm:$0xff]  ;;  %v3459_v2 = vmul.f32 0.00390625, %v978_v58 }
 0x2c8   : > { %v1098_v19 = vadd.f32 1e-05, %v1066_v14  ;;  %v1100_v10 = vadd.f32 1e-05, %v1068_v61  ;;  %v1173_v14 = vsub.f32 %v1141_v8, %v1157_v1  ;;  %v1461_v18 = vsel %vm1189_vm10, 1, %v2887_v41  ;;  %v977_v61 = vld [vmem:[#allocation2 + $0x60] sm:$0xff] }
 0x2ca   : > { %2581 = vrsqrt.f32 %v1098_v19  ;;  %v1054_v19 = vsub.f32 %v1022_v11, %v1038_v13  ;;  %v1147_v11 = vld [vmem:[#allocation12 + $0x30] sm:$0xff] }
 0x2cb   : > { %2583 = vrsqrt.f32 %v1094_v21  ;;  %v1160_v21 = vmul.f32 %v1128_v36, %v3389_v42  ;;  %v1069_v42 = vmax.f32 %v1053_v22, 0.0 }
 0x2cc   : > { %2585 = vrsqrt.f32 %v1095_v23  ;;  %v976_v23 = vld [vmem:[#allocation2 + $0x58] sm:$0xff]  ;;  %v1070_v29 = vmax.f32 %v1054_v19, 0.0 }
 0x2cd   : > { %2587 = vrsqrt.f32 %v1097_v24  ;;  %v1144_v24 = vld [vmem:[#allocation12 + $0x18] sm:$0xff]  ;;  %v3443_v31 = vmul.f32 0.00390625, %v976_v23 }
 0x2ce   : > { %2589 = vrsqrt.f32 %v1100_v10  ;;  %v1176_v32 = vsub.f32 %v1144_v24, %v1160_v21  ;;  %v1102_v12 = vadd.f32 1e-05, %v1070_v29  ;;  %v1009_v10 = vld [vmem:[#allocation3 + $0x60] sm:$0xff]  ;;  %v980_v24 = vld [vmem:[#allocation2 + $0x78] sm:$0xff] }
 0x2cf   : > { %2591 = vrsqrt.f32 %v1099_v15  ;;  %v1085_v21 = vld [vmem:[#allocation11 + $0x40] sm:$0xff] }
 0x2d0   : > { %2593 = vrsqrt.f32 %v1102_v12  ;;  %v1149_v12 = vld [vmem:[#allocation12 + $0x40] sm:$0xff] }
 0x2d4   : > { %v2582_v38 = vpop.eup %2581 }
 0x2d5   : > { %v2584_v43 = vpop.eup %2583  ;;  %v3419_v44 = vmul.f32 %v2582_v38, %v1082_v33  ;;  %v1007_v38 = vld [vmem:[#allocation3 + $0x50] sm:$0xff] }
 0x2d6   : > { %v1126_v48 = vmul.f32 %v2584_v43, %v1078_v37  ;;  %v2586_v49 = vpop.eup %2585  ;;  %v1146_v37 = vld [vmem:[#allocation12 + $0x28] sm:$0xff]  ;;  %v1040_v43 = vmul.f32 %v3443_v31, %v3443_v31  ;;  %v1023_v47 = vmul.f32 0.00390625, %v1007_v38 }
 0x2d7   : > { %1248 = vperm.xlu1 %2576, %v3419_v44   ;;  %v1127_v57 = vmul.f32 %v2586_v49, %v1079_v50  ;;  %v2588_v59 = vpop.eup %2587  ;;  %v1162_v33 = vmul.f32 %v3419_v44, %v3395_v51  ;;  %v1101_v51 = vadd.f32 1e-05, %v1069_v42  ;;  %vm1194_vm12 = vcmp.ge.f32.partialorder %v3419_v44, 0.0  ;;  %v1150_v38 = vld [vmem:[#allocation12 + $0x48] sm:$0xff] }
 0x2d8   : > { %vm1190_vm8 = vcmp.ge.f32.partialorder %v1126_v48, 0.0  ;;  %1228 = vperm.xlu0 %2575, %v1126_v48   ;;  %v3431_v7 = vmul.f32 %v2588_v59, %v1081_v60  ;;  %v1158_v46 = vmul.f32 %v1126_v48, %v3399_v56  ;;  %v1039_v48 = vmul.f32 %v3447_v34, %v3447_v34  ;;  %v2590_v49 = vpop.eup %2589 }
 0x2d9   : > { %v1462_v55 = vsel %vm1190_vm8, 1, %v2887_v41  ;;  %vm1191_vm11 = vcmp.ge.f32.partialorder %v1127_v57, 0.0  ;;  %v1159_v56 = vmul.f32 %v1127_v57, %v3403_v62  ;;  %v1178_v45 = vsub.f32 %v1146_v37, %v1162_v33 }
 0x2da   : > { %v1174_v20 = vsub.f32 %v1142_v17, %v1158_v46  ;;  %v1463_v26 = vsel %vm1191_vm11, 1, %v2887_v41  ;;  %v1161_v62 = vmul.f32 %v3431_v7, %v3407_v4  ;;  %v2592_v4 = vpop.eup %2591  ;;  %vm1193_vm13 = vcmp.ge.f32.partialorder %v3431_v7, 0.0 }
 0x2db   : > { %1481 = vperm.xlu1 %2576, %v1462_v55   ;;  %v1175_v36 = vsub.f32 %v1143_v27, %v1159_v56  ;;  %v1056_v54 = vsub.f32 %v1024_v40, %v1040_v43  ;;  %v1132_v55 = vmul.f32 %v2590_v49, %v1084_v52  ;;  %2595 = vrsqrt.f32 %v1101_v51  ;;  %v979_v27 = vld [vmem:[#allocation2 + $0x70] sm:$0xff]  ;;  %v1088_v52 = vld [vmem:[#allocation11 + $0x58] sm:$0xff] }
 0x2dc   : > { %1233 = vperm.xlu0 %2575, %v1127_v57   ;;  %v1177_v50 = vsub.f32 %v1145_v39, %v1161_v62  ;;  %v1055_v57 = vsub.f32 %v1023_v47, %v1039_v48  ;;  %v1466_v59 = vsel %vm1194_vm12, 1, %v2887_v41  ;;  %v1131_v60 = vmul.f32 %v2592_v4, %v1083_v53  ;;  %v1012_v62 = vld [vmem:[#allocation3 + $0x78] sm:$0xff]  ;;  %v1011_v39 = vld [vmem:[#allocation3 + $0x70] sm:$0xff] }
 0x2dd   : > { %v1465_v63 = vsel %vm1193_vm13, 1, %v2887_v41  ;;  %v1072_v1 = vmax.f32 %v1056_v54, 0.0  ;;  %v1164_v44 = vmul.f32 %v1132_v55, %v3413_v28  ;;  %v1042_v46 = vmul.f32 %v3459_v2, %v3459_v2  ;;  %v1087_v4 = vld [vmem:[#allocation11 + $0x50] sm:$0xff] }
 0x2de   : > { %v1071_v5 = vmax.f32 %v1055_v57, 0.0  ;;  %v1163_v8 = vmul.f32 %v1131_v60, %v3415_v30  ;;  %v1025_v17 = vmul.f32 0.00390625, %v1009_v10  ;;  %vm1196_vm14 = vcmp.ge.f32.partialorder %v1132_v55, 0.0 }
 0x2df   : > { %1487 = vperm.xlu1 %2576, %v1464_v6   ;;  %v3462_v6 = vmul.f32 0.00390625, %v977_v61  ;;  %v1104_v13 = vadd.f32 1e-05, %v1072_v1  ;;  %v1180_v15 = vsub.f32 %v1148_v9, %v1164_v44  ;;  %vm1195_vm15 = vcmp.ge.f32.partialorder %v1131_v60, 0.0  ;;  %v1152_v44 = vld [vmem:[#allocation12 + $0x58] sm:$0xff] }
 0x2e0   : > { %1243 = vperm.xlu0 %2575, %v3431_v7   ;;  %v1010_v7 = vld [vmem:[#allocation3 + $0x68] sm:$0xff]  ;;  %v1103_v16 = vadd.f32 1e-05, %v1071_v5  ;;  %v1179_v19 = vsub.f32 %v1147_v11, %v1163_v8  ;;  %v1468_v25 = vsel %vm1196_vm14, 1, %v2887_v41  ;;  %v1467_v29 = vsel %vm1195_vm15, 1, %v2887_v41  ;;  %v1151_v5 = vld [vmem:[#allocation12 + $0x50] sm:$0xff] }
 0x2e1   : > { %v1041_v28 = vmul.f32 %v3462_v6, %v3462_v6  ;;  %2597 = vrsqrt.f32 %v1104_v13  ;;  %v3471_v33 = vmul.f32 0.00390625, %v980_v24  ;;  %v1028_v43 = vmul.f32 0.00390625, %v1012_v62  ;;  %v1090_v13 = vld [vmem:[#allocation11 + $0x68] sm:$0xff] }
 0x2e2   : > { %2599 = vrsqrt.f32 %v1103_v16  ;;  %v1027_v48 = vmul.f32 0.00390625, %v1011_v39 }
 0x2e3   : > { %1319 = vperm.xlu1 %2576, %v1173_v14   ;;  %v1026_v14 = vmul.f32 0.00390625, %v1010_v7  ;;  %v1057_v56 = vsub.f32 %v1025_v17, %v1041_v28 }
 0x2e4   : > { %1478 = vperm.xlu0 %2575, %v1461_v18   ;;  %v2594_v18 = vpop.eup %2593 }
 0x2e5   : > { %v2596_v30 = vpop.eup %2595  ;;  %v1058_v22 = vsub.f32 %v1026_v14, %v1042_v46  ;;  %v1073_v35 = vmax.f32 %v1057_v56, 0.0  ;;  %v1089_v46 = vld [vmem:[#allocation11 + $0x60] sm:$0xff]  ;;  %v1091_v56 = vld [vmem:[#allocation11 + $0x70] sm:$0xff] }
 0x2e7   : > { %1324 = vperm.xlu1 %2576, %v1174_v20   ;;  %v1086_v20 = vld [vmem:[#allocation11 + $0x48] sm:$0xff]  ;;  %v1105_v47 = vadd.f32 1e-05, %v1073_v35 }
 0x2e8   : > { %1484 = vperm.xlu0 %2575, %v1463_v26   ;;  %v1134_v23 = vmul.f32 %v2594_v18, %v1086_v20  ;;  %v1133_v26 = vmul.f32 %v2596_v30, %v1085_v21  ;;  %v1154_v18 = vld [vmem:[#allocation12 + $0x68] sm:$0xff] }
 0x2ea   : > { %v1166_v42 = vmul.f32 %v1134_v23, %v3425_v0  ;;  %v1165_v37 = vmul.f32 %v1133_v26, %v3428_v3  ;;  %vm1198_vm0 = vcmp.ge.f32.partialorder %v1134_v23, 0.0  ;;  %vm1197_vm1 = vcmp.ge.f32.partialorder %v1133_v26, 0.0 }
 0x2eb   : > { %1334 = vperm.xlu1 %2576, %v1176_v32   ;;  %v1074_v32 = vmax.f32 %v1058_v22, 0.0  ;;  %v2598_v49 = vpop.eup %2597  ;;  %v1470_v57 = vsel %vm1198_vm0, 1, %v2887_v41  ;;  %v1092_v22 = vld [vmem:[#allocation11 + $0x78] sm:$0xff] }
 0x2ec   : > { %1329 = vperm.xlu0 %2575, %v1175_v36   ;;  %v3474_v36 = vmul.f32 0.00390625, %v979_v27  ;;  %v1182_v51 = vsub.f32 %v1150_v38, %v1166_v42  ;;  %v2600_v3 = vpop.eup %2599  ;;  %v1136_v54 = vmul.f32 %v2598_v49, %v1088_v52  ;;  %v1816_v38 = vld [vmem:[#allocation14 + $0x18] sm:$0xff]  ;;  %v1206_v52 = vld [vmem:[#allocation4 + $0x8] sm:$0xff] }
 0x2ed   : > { %v1106_v40 = vadd.f32 1e-05, %v1074_v32  ;;  %v1135_v58 = vmul.f32 %v2600_v3, %v1087_v4  ;;  %v1155_v32 = vld [vmem:[#allocation12 + $0x70] sm:$0xff]  ;;  %1962 = vmatprep.mubr.f32.mxu1 %v1816_v38 }
 0x2ee   : > { %v1043_v0 = vmul.f32 %v3474_v36, %v3474_v36  ;;  %v1168_v61 = vmul.f32 %v1136_v54, %v3443_v31  ;;  %vm1200_vm2 = vcmp.ge.f32.partialorder %v1136_v54, 0.0 }
 0x2ef   : > { %1344 = vperm.xlu1 %2576, %v1178_v45   ;;  %v1044_v45 = vmul.f32 %v3471_v33, %v3471_v33  ;;  %2601 = vrsqrt.f32 %v1106_v40  ;;  %v1167_v1 = vmul.f32 %v1135_v58, %v3447_v34  ;;  %vm1199_vm3 = vcmp.ge.f32.partialorder %v1135_v58, 0.0 }
 0x2f0   : > { %1339 = vperm.xlu0 %2575, %v1177_v50   ;;  %v1181_v50 = vsub.f32 %v1149_v12, %v1165_v37  ;;  %2603 = vrsqrt.f32 %v1105_v47  ;;  %v1184_v8 = vsub.f32 %v1152_v44, %v1168_v61  ;;  %v1472_v34 = vsel %vm1200_vm2, 1, %v2887_v41  ;;  %v1413_v47 = vld [vmem:[#allocation5] sm:$0xff] }
 0x2f1   : > { %v1060_v53 = vsub.f32 %v1028_v43, %v1044_v45  ;;  %v1183_v11 = vsub.f32 %v1151_v5, %v1167_v1  ;;  %v1471_v16 = vsel %vm1199_vm3, 1, %v2887_v41  ;;  %v1415_v1 = vld [vmem:[#allocation5 + $0x10] sm:$0xff] }
 0x2f3   : > { %1493 = vperm.xlu1 %2576, %v1466_v59   ;;  %v1469_v59 = vsel %vm1197_vm1, 1, %v2887_v41 }
 0x2f4   : > { %1490 = vperm.xlu0 %2575, %v1465_v63  }
 0x2f7   : > { %1258 = vperm.xlu1 %2576, %v1132_v55   ;;  %v1059_v55 = vsub.f32 %v1027_v48, %v1043_v0 }
 0x2f8   : > { %1253 = vperm.xlu0 %2575, %v1131_v60   ;;  %v1076_v60 = vmax.f32 %v1060_v53, 0.0 }
 0x2f9   : > { %v1075_v63 = vmax.f32 %v1059_v55, 0.0  ;;  %v2602_v10 = vpop.eup %2601 }
 0x2fa   : > { %v1108_v7 = vadd.f32 1e-05, %v1076_v60  ;;  %v2604_v14 = vpop.eup %2603  ;;  %v1138_v31 = vmul.f32 %v2602_v10, %v1090_v13  ;;  %v1416_v60 = vld [vmem:[#allocation5 + $0x18] sm:$0xff] }
 0x2fb   : > { %1354 = vperm.xlu1 %2576, %v1180_v15   ;;  %v1107_v9 = vadd.f32 1e-05, %v1075_v63  ;;  %v1137_v15 = vmul.f32 %v2604_v14, %v1089_v46  ;;  %v1207_v63 = vld [vmem:[#allocation4 + $0x10] sm:$0xff] }
 0x2fc   : > { %1349 = vperm.xlu0 %2575, %v1179_v19   ;;  %2605 = vrsqrt.f32 %v1108_v7  ;;  %v1170_v17 = vmul.f32 %v1138_v31, %v3459_v2  ;;  %v1153_v19 = vld [vmem:[#allocation12 + $0x60] sm:$0xff]  ;;  %vm1202_vm4 = vcmp.ge.f32.partialorder %v1138_v31, 0.0 }
 0x2fd   : > { %2607 = vrsqrt.f32 %v1107_v9  ;;  %v1169_v28 = vmul.f32 %v1137_v15, %v3462_v6  ;;  %vm1201_vm5 = vcmp.ge.f32.partialorder %v1137_v15, 0.0  ;;  %v1474_v2 = vsel %vm1202_vm4, 1, %v2887_v41 }
 0x2fe   : > { %v1186_v20 = vsub.f32 %v1154_v18, %v1170_v17  ;;  %v1473_v6 = vsel %vm1201_vm5, 1, %v2887_v41  ;;  %v1210_v17 = vld [vmem:[#allocation4 + $0x28] sm:$0xff] }
 0x2ff   : > { %1499 = vperm.xlu1 %2576, %v1468_v25   ;;  %v1185_v21 = vsub.f32 %v1153_v19, %v1169_v28  ;;  %v1418_v28 = vld [vmem:[#allocation5 + $0x28] sm:$0xff]  ;;  %v1209_v19 = vld [vmem:[#allocation4 + $0x20] sm:$0xff] }
 0x300   : > { %1496 = vperm.xlu0 %2575, %v1467_v29   ;;  %v1156_v29 = vld [vmem:[#allocation12 + $0x78] sm:$0xff] }
 0x303   : > { %1268 = vperm.xlu1 %2576, %v1134_v23  }
 0x304   : > { %1263 = vperm.xlu0 %2575, %v1133_v26  }
 0x306   : > { %v2606_v30 = vpop.eup %2605 }
 0x307   : > { %1364 = vperm.xlu1 %2576, %v1182_v51   ;;  %v2608_v23 = vpop.eup %2607  ;;  %v1140_v24 = vmul.f32 %v2606_v30, %v1092_v22  ;;  %v1205_v51 = vld [vmem:[#allocation4] sm:$0xff] }
 0x308   : > { %1359 = vperm.xlu0 %2575, %v1181_v50   ;;  %v1139_v25 = vmul.f32 %v2608_v23, %v1091_v56 }
 0x309   : > { %v1172_v26 = vmul.f32 %v1140_v24, %v3471_v33  ;;  %vm1204_vm6 = vcmp.ge.f32.partialorder %v1140_v24, 0.0  ;;  %v1814_v33 = vld [vmem:[#allocation14 + $0x8] sm:$0xff] }
 0x30a   : > { %v1171_v27 = vmul.f32 %v1139_v25, %v3474_v36  ;;  %vm1203_vm8 = vcmp.ge.f32.partialorder %v1139_v25, 0.0  ;;  %v1476_v62 = vsel %vm1204_vm6, 1, %v2887_v41  ;;  %1887 = vmatprep.mubr.f32.mxu0 %v1814_v33 }
 0x30b   : > { %1505 = vperm.xlu1 %2576, %v1470_v57   ;;  %v1188_v42 = vsub.f32 %v1156_v29, %v1172_v26  ;;  %v1475_v37 = vsel %vm1203_vm8, 1, %v2887_v41  ;;  %v1414_v41 = vld [vmem:[#allocation5 + $0x8] sm:$0xff] }
 0x30c   : > { %1502 = vperm.xlu0 %2575, %v1469_v59   ;;  %v1187_v35 = vsub.f32 %v1155_v32, %v1171_v27  ;;  %v1208_v59 = vld [vmem:[#allocation4 + $0x18] sm:$0xff] }
 0x30f   : > { %1278 = vperm.xlu1 %2576, %v1136_v54  }
 0x310   : > { %1273 = vperm.xlu0 %2575, %v1135_v58  }
 0x313   : > { %1374 = vperm.xlu1 %2576, %v1184_v8  }
 0x314   : > { %1369 = vperm.xlu0 %2575, %v1183_v11  }
 0x317   : > { %1511 = vperm.xlu1 %2576, %v1472_v34  }
 0x318   : > { %1508 = vperm.xlu0 %2575, %v1471_v16  }
 0x31b   : > { %1288 = vperm.xlu1 %2576, %v1138_v31  }
 0x31c   : > { %1283 = vperm.xlu0 %2575, %v1137_v15  }
 0x31f   : > { %1384 = vperm.xlu1 %2576, %v1186_v20   ;;  %v1417_v20 = vld [vmem:[#allocation5 + $0x20] sm:$0xff] }
 0x320   : > { %1379 = vperm.xlu0 %2575, %v1185_v21  }
 0x323   : > { %1517 = vperm.xlu1 %2576, %v1474_v2  }
 0x324   : > { %1514 = vperm.xlu0 %2575, %v1473_v6  }
 0x327   : > { %1298 = vperm.xlu1 %2576, %v1140_v24  }
 0x328   : > { %1293 = vperm.xlu0 %2575, %v1139_v25  }
 0x32b   : > { %1394 = vperm.xlu1 %2576, %v1188_v42  }
 0x32c   : > { %1389 = vperm.xlu0 %2575, %v1187_v35  }
 0x32f   : > { %1523 = vperm.xlu1 %2576, %v1476_v62  }
 0x330   : > { %1520 = vperm.xlu0 %2575, %v1475_v37  }
 0x344   : > { %v1239_v36 = vpop.permute.xlu1 %1238 }
 0x345   : > { %v1224_v39 = vpop.permute.xlu0 %1223  ;;  %v1304_v8 = vmul.f32 %v1239_v36, %v1208_v59  ;;  %v1432_v9 = vmul.f32 %v1416_v60, %v1239_v36 }
 0x346   : > { %v1301_v49 = vmul.f32 %v1224_v39, %v1205_v51  ;;  %v1429_v50 = vmul.f32 %v1413_v47, %v1224_v39  ;;  %v1212_v39 = vld [vmem:[#allocation4 + $0x38] sm:$0xff] }
 0x356   : > { %v1249_v12 = vpop.permute.xlu1 %1248 }
 0x357   : > { %v1229_v40 = vpop.permute.xlu0 %1228  ;;  %v1306_v56 = vmul.f32 %v1249_v12, %v1210_v17  ;;  %v1434_v24 = vmul.f32 %v1418_v28, %v1249_v12  ;;  %v1420_v12 = vld [vmem:[#allocation5 + $0x38] sm:$0xff] }
 0x358   : > { %v1302_v55 = vmul.f32 %v1229_v40, %v1206_v52  ;;  %v1430_v57 = vmul.f32 %v1414_v41, %v1229_v40 }
 0x35a   : > { %v1482_v43 = vpop.permute.xlu1 %1481 }
 0x35b   : > { %v1234_v45 = vpop.permute.xlu0 %1233  ;;  %vm1526_vm10 = vcmp.eq.s32.totalorder %v1482_v43, 1  ;;  %v1211_v43 = vld [vmem:[#allocation4 + $0x30] sm:$0xff] }
 0x35c   : > { %v1303_v11 = vmul.f32 %v1234_v45, %v1207_v63  ;;  %v1431_v13 = vmul.f32 %v1415_v1, %v1234_v45  ;;  %v1419_v45 = vld [vmem:[#allocation5 + $0x30] sm:$0xff] }
 0x35e   : > { %v1488_v48 = vpop.permute.xlu1 %1487 }
 0x35f   : > { %v1244_v0 = vpop.permute.xlu0 %1243  ;;  %vm1528_vm11 = vcmp.eq.s32.totalorder %v1488_v48, 1 }
 0x360   : > { %v1305_v2 = vmul.f32 %v1244_v0, %v1209_v19  ;;  %v1433_v25 = vmul.f32 %v1417_v20, %v1244_v0 }
 0x362   : > { %v1320_v3 = vpop.permute.xlu1 %1319 }
 0x363   : > { %v1479_v4 = vpop.permute.xlu0 %1478  ;;  %v1397_v53 = vadd.f32 %v1320_v3, %v1301_v49  ;;  %v1445_v54 = vadd.f32 %v1429_v50, %v1320_v3 }
 0x364   : > { %vm1525_vm9 = vcmp.eq.s32.totalorder %v1479_v4, 1 }
 0x365   : > { %v1541_v58 = vsel %vm1525_vm9, %v1397_v53, %v1445_v54 }
 0x366   : > { %2609 = vtanh.f32 %v1541_v58  ;;  %v1325_v61 = vpop.permute.xlu1 %1324 }
 0x367   : > { %v1485_v44 = vpop.permute.xlu0 %1484  ;;  %v1398_v5 = vadd.f32 %v1325_v61, %v1302_v55  ;;  %v1446_v7 = vadd.f32 %v1430_v57, %v1325_v61 }
 0x368   : > { %vm1527_vm12 = vcmp.eq.s32.totalorder %v1485_v44, 1 }
 0x369   : > { %v1542_v10 = vsel %vm1526_vm10, %v1398_v5, %v1446_v7 }
 0x36a   : > { %2611 = vtanh.f32 %v1542_v10  ;;  %v1335_v14 = vpop.permute.xlu1 %1334 }
 0x36b   : > { %v1330_v46 = vpop.permute.xlu0 %1329  ;;  %v1400_v31 = vadd.f32 %v1335_v14, %v1304_v8  ;;  %v1448_v34 = vadd.f32 %v1432_v9, %v1335_v14 }
 0x36c   : > { %v1399_v15 = vadd.f32 %v1330_v46, %v1303_v11  ;;  %v1447_v16 = vadd.f32 %v1431_v13, %v1330_v46 }
 0x36d   : > { %v1544_v18 = vsel %vm1528_vm11, %v1400_v31, %v1448_v34  ;;  %v2888_v31 = vmov 1.0|1.0  }
 0x36e   : > { %v1543_v30 = vsel %vm1527_vm12, %v1399_v15, %v1447_v16  ;;  %2613 = vtanh.f32 %v1544_v18  ;;  %v1345_v21 = vpop.permute.xlu1 %1344 }
 0x36f   : > { %2615 = vtanh.f32 %v1543_v30  ;;  %v1340_v22 = vpop.permute.xlu0 %1339  ;;  %v1402_v26 = vadd.f32 %v1345_v21, %v1306_v56  ;;  %v1450_v27 = vadd.f32 %v1434_v24, %v1345_v21 }
 0x370   : > { %v2610_v23 = vpop.eup %2609  ;;  %v1401_v32 = vadd.f32 %v1340_v22, %v1305_v2  ;;  %v1449_v42 = vadd.f32 %v1433_v25, %v1340_v22 }
 0x371   : > { %v1573_v6 = vmul.f32 4.0, %v2610_v23  ;;  %v3495_v38 = vmul.f32 1.875, %v2610_v23  ;;  %v1685_v50 = vmul.f32 1.8666667, %v2610_v23 }
 0x372   : > { %v1494_v29 = vpop.permute.xlu1 %1493 }
 0x373   : > { %v1491_v35 = vpop.permute.xlu0 %1490  ;;  %vm1530_vm13 = vcmp.eq.s32.totalorder %v1494_v29, 1  ;;  %v1605_v62 = vmul.f32 0.5, %v1573_v6 }
 0x374   : > { %v2612_v37 = vpop.eup %2611  ;;  %vm1529_vm14 = vcmp.eq.s32.totalorder %v1491_v35, 1  ;;  %v1546_v33 = vsel %vm1530_vm13, %v1402_v26, %v1450_v27  ;;  %v1214_v35 = vld [vmem:[#allocation4 + $0x48] sm:$0xff] }
 0x375   : > { %v1545_v36 = vsel %vm1529_vm14, %v1401_v32, %v1449_v42  ;;  %2617 = vtanh.f32 %v1546_v33  ;;  %v1574_v40 = vmul.f32 4.0, %v2612_v37  ;;  %v1653_v47 = vmul.f32 %v3495_v38, %v1605_v62 }
 0x376   : > { %2619 = vtanh.f32 %v1545_v36  ;;  %v1259_v51 = vpop.permute.xlu1 %1258  ;;  %v3498_v49 = vmul.f32 1.875, %v2612_v37  ;;  %v1686_v52 = vmul.f32 1.8666667, %v2612_v37  ;;  %v1733_v54 = vmul.f32 -0.8, %v1605_v62 }
 0x377   : > { %v1254_v48 = vpop.permute.xlu0 %1253  ;;  %v1606_v0 = vmul.f32 0.5, %v1574_v40  ;;  %v1308_v3 = vmul.f32 %v1259_v51, %v1212_v39  ;;  %v1436_v4 = vmul.f32 %v1420_v12, %v1259_v51  ;;  %v3500_v53 = vadd.f32 -0.75, %v1653_v47  ;;  %v1213_v39 = vld [vmem:[#allocation4 + $0x40] sm:$0xff]  ;;  %v1422_v40 = vld [vmem:[#allocation5 + $0x48] sm:$0xff] }
 0x378   : > { %v2614_v41 = vpop.eup %2613  ;;  %v1307_v57 = vmul.f32 %v1254_v48, %v1211_v43  ;;  %v1435_v61 = vmul.f32 %v1419_v45, %v1254_v48  ;;  %v1421_v51 = vld [vmem:[#allocation5 + $0x40] sm:$0xff] }
 0x379   : > { %v2616_v55 = vpop.eup %2615  ;;  %v2355_v58 = vpack.c.bf16 %v1606_v0, %v1605_v62  ;;  %v1576_v59 = vmul.f32 4.0, %v2614_v41  ;;  %v1654_v60 = vmul.f32 %v3498_v49, %v1606_v0  ;;  %v1717_v44 = vmul.f32 %v1685_v50, %v3500_v53 }
 0x37a   : > { %v1355_v63 = vpop.permute.xlu1 %1354  ;;  %v1575_v1 = vmul.f32 4.0, %v2616_v55  ;;  %v1734_v5 = vmul.f32 -0.8, %v1606_v0  ;;  %v3506_v10 = vmul.f32 1.875, %v2616_v55  ;;  %v3508_v11 = vmul.f32 1.875, %v2614_v41 }
 0x37b   : > { %v1350_v7 = vpop.permute.xlu0 %1349  ;;  %2356 = vmatprep.subr.bf16.mxu0 %v2355_v58  ;;  %v1608_v8 = vmul.f32 0.5, %v1576_v59  ;;  %v3504_v9 = vadd.f32 -0.75, %v1654_v60  ;;  %v1404_v14 = vadd.f32 %v1355_v63, %v1308_v3  ;;  %v1452_v46 = vadd.f32 %v1436_v4, %v1355_v63 }
 0x37c   : > { %v1403_v13 = vadd.f32 %v1350_v7, %v1307_v57  ;;  %2357 = vmatpush3.bf16.msra.mxu0 %v2888_v31  ;;  %v1607_v34 = vmul.f32 0.5, %v1575_v1  ;;  %v1451_v15 = vadd.f32 %v1435_v61, %v1350_v7  ;;  %v1749_v17 = vadd.f32 %v1733_v54, %v1717_v44 }
 0x37d   : > { %v1718_v16 = vmul.f32 %v1686_v52, %v3504_v9  ;;  %v1656_v28 = vmul.f32 %v3508_v11, %v1608_v8  ;;  %v2381_v20 = vpack.c.bf16 %v3504_v9, %v3500_v53  ;;  %v1687_v21 = vmul.f32 1.8666667, %v2616_v55 }
 0x37e   : > { %v1500_v18 = vpop.permute.xlu1 %1499  ;;  %v2358_v19 = vpack.c.bf16 %v1608_v8, %v1607_v34  ;;  %v1655_v30 = vmul.f32 %v3506_v10, %v1607_v34  ;;  %v1688_v2 = vmul.f32 1.8666667, %v2614_v41  ;;  %v1735_v42 = vmul.f32 -0.8, %v1607_v34 }
 0x37f   : > { %v2618_v22 = vpop.eup %2617  ;;  %v1497_v23 = vpop.permute.xlu0 %1496  ;;  %vm1532_vm15 = vcmp.eq.s32.totalorder %v1500_v18, 1  ;;  %v1750_v56 = vadd.f32 %v1734_v5, %v1718_v16  ;;  %v3516_v24 = vadd.f32 -0.75, %v1656_v28  ;;  %v1736_v45 = vmul.f32 -0.8, %v1608_v8 }
 0x380   : > { %v2620_v25 = vpop.eup %2619  ;;  %vm1531_vm0 = vcmp.eq.s32.totalorder %v1497_v23, 1  ;;  %v1548_v6 = vsel %vm1532_vm15, %v1404_v14, %v1452_v46  ;;  %2359 = vmatprep.subr.bf16.mxu0 %v2358_v19  ;;  %v1578_v26 = vmul.f32 4.0, %v2618_v22  ;;  %v3518_v27 = vadd.f32 -0.75, %v1655_v30 }
 0x381   : > { %v1547_v29 = vsel %vm1531_vm0, %v1403_v13, %v1451_v15  ;;  %2621 = vtanh.f32 %v1548_v6  ;;  %v2379_v32 = vpack.c.bf16 %v1750_v56, %v1749_v17  ;;  %2360 = vmatpush3.bf16.msra.mxu0 %v2888_v31  ;;  %v1577_v37 = vmul.f32 4.0, %v2620_v25  ;;  %v1216_v6 = vld [vmem:[#allocation4 + $0x58] sm:$0xff] }
 0x382   : > { %2623 = vtanh.f32 %v1547_v29  ;;  %v1269_v62 = vpop.permute.xlu1 %1268  ;;  %v1610_v33 = vmul.f32 0.5, %v1578_v26  ;;  %v1719_v36 = vmul.f32 %v1687_v21, %v3518_v27  ;;  %v1720_v43 = vmul.f32 %v1688_v2, %v3516_v24  ;;  %v1424_v26 = vld [vmem:[#allocation5 + $0x58] sm:$0xff] }
 0x383   : > { %v1264_v12 = vpop.permute.xlu0 %1263  ;;  %2380 = vmatprep.subr.bf16.mxu1 %v2379_v32  ;;  %v1765_v47 = vmul.f32 %v1749_v17, %v3495_v38  ;;  %v1609_v48 = vmul.f32 0.5, %v1577_v37  ;;  %v1310_v50 = vmul.f32 %v1269_v62, %v1214_v35  ;;  %v1766_v52 = vmul.f32 %v1750_v56, %v3498_v49  ;;  %v1215_v35 = vld [vmem:[#allocation4 + $0x50] sm:$0xff] }
 0x384   : > { %2382 = vmatpush3.bf16.msra.mxu1 %v2381_v20  ;;  %v1751_v0 = vadd.f32 %v1735_v42, %v1719_v36  ;;  %v1752_v41 = vadd.f32 %v1736_v45, %v1720_v43  ;;  %v3525_v3 = vmul.f32 1.875, %v2620_v25  ;;  %v1309_v4 = vmul.f32 %v1264_v12, %v1213_v39 }
 0x385   : > { %v1438_v54 = vmul.f32 %v1422_v40, %v1269_v62  ;;  %v2361_v55 = vpack.c.bf16 %v1610_v33, %v1609_v48  ;;  %v3527_v58 = vmul.f32 1.875, %v2618_v22  ;;  %v1437_v59 = vmul.f32 %v1421_v51, %v1264_v12  ;;  %v1423_v12 = vld [vmem:[#allocation5 + $0x50] sm:$0xff] }
 0x386   : > { %v1365_v57 = vpop.permute.xlu1 %1364  ;;  %v2383_v61 = vpack.c.bf16 %v1752_v41, %v1751_v0  ;;  %v2385_v38 = vpack.c.bf16 %v3516_v24, %v3518_v27  ;;  %v1657_v63 = vmul.f32 %v3525_v3, %v1609_v48  ;;  %v1689_v1 = vmul.f32 1.8666667, %v2620_v25 }
 0x387   : > { %v1360_v60 = vpop.permute.xlu0 %1359  ;;  %2362 = vmatprep.subr.bf16.mxu0 %v2361_v55  ;;  %v1658_v49 = vmul.f32 %v3527_v58, %v1610_v33  ;;  %v1690_v44 = vmul.f32 1.8666667, %v2618_v22  ;;  %v1737_v5 = vmul.f32 -0.8, %v1609_v48  ;;  %v1406_v7 = vadd.f32 %v1365_v57, %v1310_v50 }
 0x388   : > { %2384 = vmatprep.subr.bf16.mxu1 %v2383_v61  ;;  %v3533_v8 = vadd.f32 -0.75, %v1657_v63  ;;  %2363 = vmatpush3.bf16.msra.mxu0 %v2888_v31  ;;  %v1781_v13 = vmul.f32 -0.8333333, %v3500_v53  ;;  %v1782_v14 = vmul.f32 -0.8333333, %v3504_v9  ;;  %v1405_v46 = vadd.f32 %v1360_v60, %v1309_v4 }
 0x389   : > { %v1453_v34 = vadd.f32 %v1437_v59, %v1360_v60  ;;  %v1454_v15 = vadd.f32 %v1438_v54, %v1365_v57  ;;  %2386 = vmatpush3.bf16.msra.mxu1 %v2385_v38  ;;  %v3538_v17 = vadd.f32 -0.75, %v1658_v49  ;;  %v1738_v9 = vmul.f32 -0.8, %v1610_v33 }
 0x38a   : > { %v1506_v16 = vpop.permute.xlu1 %1505  ;;  %v1721_v19 = vmul.f32 %v1689_v1, %v3533_v8  ;;  %v1797_v20 = vadd.f32 %v1781_v13, %v1765_v47  ;;  %v1798_v30 = vadd.f32 %v1782_v14, %v1766_v52  ;;  %v1767_v42 = vmul.f32 %v1751_v0, %v3506_v10 }
 0x38b   : > { %v2622_v28 = vpop.eup %2621  ;;  %v1503_v18 = vpop.permute.xlu0 %1502  ;;  %vm1534_vm1 = vcmp.eq.s32.totalorder %v1506_v16, 1  ;;  %v1722_v53 = vmul.f32 %v1690_v44, %v3538_v17  ;;  %v1768_v39 = vmul.f32 %v1752_v41, %v3508_v11  ;;  %v1783_v33 = vmul.f32 -0.8333333, %v3518_v27 }
 0x38c   : > { %v2624_v21 = vpop.eup %2623  ;;  %vm1533_vm2 = vcmp.eq.s32.totalorder %v1503_v18, 1  ;;  %v1550_v22 = vsel %vm1534_vm1, %v1406_v7, %v1454_v15  ;;  %v1753_v56 = vadd.f32 %v1737_v5, %v1721_v19  ;;  %v1580_v32 = vmul.f32 4.0, %v2622_v28 }
 0x38d   : > { %v1549_v23 = vsel %vm1533_vm2, %v1405_v46, %v1453_v34  ;;  %2625 = vtanh.f32 %v1550_v22  ;;  %v1579_v2 = vmul.f32 4.0, %v2624_v21  ;;  %v1754_v25 = vadd.f32 %v1738_v9, %v1722_v53 }
 0x38e   : > { %2627 = vtanh.f32 %v1549_v23  ;;  %v1279_v29 = vpop.permute.xlu1 %1278  ;;  %v3543_v36 = vmul.f32 1.875, %v2624_v21  ;;  %v1612_v43 = vmul.f32 0.5, %v1580_v32  ;;  %v3547_v45 = vmul.f32 1.875, %v2622_v28 }
 0x38f   : > { %v1274_v62 = vpop.permute.xlu0 %1273  ;;  %v1611_v37 = vmul.f32 0.5, %v1579_v2  ;;  %v2387_v40 = vpack.c.bf16 %v1754_v25, %v1753_v56  ;;  %v1784_v51 = vmul.f32 -0.8333333, %v3516_v24  ;;  %v1312_v47 = vmul.f32 %v1279_v29, %v1216_v6 }
 0x390   : > { %v1440_v48 = vmul.f32 %v1424_v26, %v1279_v29  ;;  %v2389_v10 = vpack.c.bf16 %v3538_v17, %v3533_v8  ;;  %v1311_v50 = vmul.f32 %v1274_v62, %v1215_v35  ;;  %v1660_v27 = vmul.f32 %v3547_v45, %v1612_v43  ;;  %v1218_v29 = vld [vmem:[#allocation4 + $0x68] sm:$0xff] }
 0x391   : > { %v1659_v0 = vmul.f32 %v3543_v36, %v1611_v37  ;;  %2388 = vmatprep.subr.bf16.mxu1 %v2387_v40  ;;  %v2364_v52 = vpack.c.bf16 %v1612_v43, %v1611_v37  ;;  %v3554_v41 = vpack.c.bf16 %v1798_v30, %v1797_v20  ;;  %v1439_v4 = vmul.f32 %v1423_v12, %v1274_v62  ;;  %v1426_v35 = vld [vmem:[#allocation5 + $0x68] sm:$0xff] }
 0x392   : > { %v1375_v11 = vpop.permute.xlu1 %1374  ;;  %2390 = vmatpush3.bf16.msra.mxu1 %v2389_v10  ;;  %v1691_v24 = vmul.f32 1.8666667, %v2624_v21  ;;  %v1799_v57 = vadd.f32 %v1783_v33, %v1767_v42  ;;  %v3558_v59 = vadd.f32 -0.75, %v1660_v27  ;;  %v1692_v60 = vmul.f32 1.8666667, %v2622_v28  ;;  %v1425_v33 = vld [vmem:[#allocation5 + $0x60] sm:$0xff] }
 0x393   : > { %v1370_v54 = vpop.permute.xlu0 %1369  ;;  %v3556_v55 = vadd.f32 -0.75, %v1659_v0  ;;  %2365 = vmatprep.subr.bf16.mxu0 %v2364_v52  ;;  %v1739_v61 = vmul.f32 -0.8, %v1611_v37  ;;  %v1800_v38 = vadd.f32 %v1784_v51, %v1768_v39  ;;  %v1408_v63 = vadd.f32 %v1375_v11, %v1312_v47  ;;  %v1217_v39 = vld [vmem:[#allocation4 + $0x60] sm:$0xff] }
 0x394   : > { %v1456_v49 = vadd.f32 %v1440_v48, %v1375_v11  ;;  %v1740_v44 = vmul.f32 -0.8, %v1612_v43  ;;  %2366 = vmatpush3.bf16.msra.mxu0 %v2888_v31  ;;  %v1407_v5 = vadd.f32 %v1370_v54, %v1311_v50  ;;  %v1455_v7 = vadd.f32 %v1439_v4, %v1370_v54 }
 0x395   : > { %v1723_v1 = vmul.f32 %v1691_v24, %v3556_v55  ;;  %v1724_v14 = vmul.f32 %v1692_v60, %v3558_v59  ;;  %v3563_v46 = vpack.c.bf16 %v1800_v38, %v1799_v57  ;;  %v1769_v28 = vmul.f32 %v1753_v56, %v3525_v3 }
 0x396   : > { %v1512_v13 = vpop.permute.xlu1 %1511  ;;  %v1770_v18 = vmul.f32 %v1754_v25, %v3527_v58  ;;  %v1785_v9 = vmul.f32 -0.8333333, %v3533_v8  ;;  %v2393_v56 = vpack.c.bf16 %v3558_v59, %v3556_v55  ;;  %v1786_v8 = vmul.f32 -0.8333333, %v3538_v17 }
 0x397   : > { %v2626_v34 = vpop.eup %2625  ;;  %v1509_v15 = vpop.permute.xlu0 %1508  ;;  %vm1536_vm3 = vcmp.eq.s32.totalorder %v1512_v13, 1  ;;  %v3565_v16 = vadd.f32 %v1739_v61, %v1723_v1  ;;  %v3569_v30 = vadd.f32 %v1740_v44, %v1724_v14 }
 0x398   : > { %v2628_v19 = vpop.eup %2627  ;;  %vm1535_vm4 = vcmp.eq.s32.totalorder %v1509_v15, 1  ;;  %v1552_v20 = vsel %vm1536_vm3, %v1408_v63, %v1456_v49  ;;  %v1582_v21 = vmul.f32 4.0, %v2626_v34  ;;  %v3574_v3 = vmul.f32 1.875, %v2626_v34 }
 0x399   : > { %v1551_v22 = vsel %vm1535_vm4, %v1407_v5, %v1455_v7  ;;  %2629 = vtanh.f32 %v1552_v20  ;;  %v1581_v53 = vmul.f32 4.0, %v2628_v19  ;;  %v2391_v23 = vpack.c.bf16 %v3569_v30, %v3565_v16 }
 0x39a   : > { %2631 = vtanh.f32 %v1551_v22  ;;  %v1289_v2 = vpop.permute.xlu1 %1288  ;;  %v1614_v6 = vmul.f32 0.5, %v1582_v21  ;;  %v3578_v26 = vmul.f32 1.875, %v2628_v19  ;;  %v1801_v42 = vadd.f32 %v1785_v9, %v1769_v28 }
 0x39b   : > { %v1284_v58 = vpop.permute.xlu0 %1283  ;;  %v1613_v25 = vmul.f32 0.5, %v1581_v53  ;;  %2392 = vmatprep.subr.bf16.mxu1 %v2391_v23  ;;  %v1694_v43 = vmul.f32 1.8666667, %v2626_v34  ;;  %v1802_v51 = vadd.f32 %v1786_v8, %v1770_v18  ;;  %v1314_v47 = vmul.f32 %v1289_v2, %v1218_v29  ;;  %v1427_v29 = vld [vmem:[#allocation5 + $0x70] sm:$0xff] }
 0x39c   : > { %v1662_v32 = vmul.f32 %v3574_v3, %v1614_v6  ;;  %2394 = vmatpush3.bf16.msra.mxu1 %v2393_v56  ;;  %v1693_v0 = vmul.f32 1.8666667, %v2628_v19  ;;  %v1442_v17 = vmul.f32 %v1426_v35, %v1289_v2  ;;  %v1742_v52 = vmul.f32 -0.8, %v1614_v6  ;;  %v1220_v2 = vld [vmem:[#allocation4 + $0x78] sm:$0xff] }
 0x39d   : > { %v2367_v62 = vpack.c.bf16 %v1614_v6, %v1613_v25  ;;  %v1661_v37 = vmul.f32 %v3578_v26, %v1613_v25  ;;  %v3589_v11 = vpack.c.bf16 %v1802_v51, %v1801_v42  ;;  %v1313_v27 = vmul.f32 %v1284_v58, %v1217_v39  ;;  %v1428_v6 = vld [vmem:[#allocation5 + $0x78] sm:$0xff] }
 0x39e   : > { %v1385_v12 = vpop.permute.xlu1 %1384  ;;  %v3583_v40 = vadd.f32 -0.75, %v1662_v32  ;;  %v1441_v4 = vmul.f32 %v1425_v33, %v1284_v58  ;;  %v1741_v24 = vmul.f32 -0.8, %v1613_v25  ;;  %v1219_v25 = vld [vmem:[#allocation4 + $0x70] sm:$0xff] }
 0x39f   : > { %v1380_v48 = vpop.permute.xlu0 %1379  ;;  %2368 = vmatprep.subr.bf16.mxu0 %v2367_v62  ;;  %v3585_v10 = vadd.f32 -0.75, %v1661_v37  ;;  %v1410_v57 = vadd.f32 %v1385_v12, %v1314_v47  ;;  %v1458_v60 = vadd.f32 %v1442_v17, %v1385_v12 }
 0x3a0   : > { %v1726_v50 = vmul.f32 %v1694_v43, %v3583_v40  ;;  %2369 = vmatpush3.bf16.msra.mxu0 %v2888_v31  ;;  %v1409_v49 = vadd.f32 %v1380_v48, %v1313_v27  ;;  %v1457_v1 = vadd.f32 %v1441_v4, %v1380_v48 }
 0x3a1   : > { %v1725_v54 = vmul.f32 %v1693_v0, %v3585_v10  ;;  %v2397_v19 = vpack.c.bf16 %v3583_v40, %v3585_v10 }
 0x3a2   : > { %v1518_v61 = vpop.permute.xlu1 %1517  ;;  %v3592_v38 = vadd.f32 %v1742_v52, %v1726_v50 }
 0x3a3   : > { %v2630_v63 = vpop.eup %2629  ;;  %v1515_v44 = vpop.permute.xlu0 %1514  ;;  %vm1538_vm5 = vcmp.eq.s32.totalorder %v1518_v61, 1  ;;  %v3594_v5 = vadd.f32 %v1741_v24, %v1725_v54 }
 0x3a4   : > { %v2632_v7 = vpop.eup %2631  ;;  %vm1537_vm6 = vcmp.eq.s32.totalorder %v1515_v44, 1  ;;  %v1554_v13 = vsel %vm1538_vm5, %v1410_v57, %v1458_v60  ;;  %v1584_v14 = vmul.f32 4.0, %v2630_v63  ;;  %v3600_v21 = vmul.f32 1.875, %v2630_v63 }
 0x3a5   : > { %v1553_v34 = vsel %vm1537_vm6, %v1409_v49, %v1457_v1  ;;  %2633 = vtanh.f32 %v1554_v13  ;;  %v2395_v15 = vpack.c.bf16 %v3592_v38, %v3594_v5  ;;  %v1583_v28 = vmul.f32 4.0, %v2632_v7 }
 0x3a6   : > { %2635 = vtanh.f32 %v1553_v34  ;;  %v1299_v18 = vpop.permute.xlu1 %1298  ;;  %v1616_v20 = vmul.f32 0.5, %v1584_v14  ;;  %v3602_v9 = vmul.f32 1.875, %v2632_v7  ;;  %v1696_v42 = vmul.f32 1.8666667, %v2630_v63 }
 0x3a7   : > { %v1294_v22 = vpop.permute.xlu0 %1293  ;;  %2396 = vmatprep.subr.bf16.mxu1 %v2395_v15  ;;  %v1615_v53 = vmul.f32 0.5, %v1583_v28  ;;  %v1695_v37 = vmul.f32 1.8666667, %v2632_v7  ;;  %v1316_v39 = vmul.f32 %v1299_v18, %v1220_v2  ;;  %v1444_v33 = vmul.f32 %v1428_v6, %v1299_v18 }
 0x3a8   : > { %2398 = vmatpush3.bf16.msra.mxu1 %v2397_v19  ;;  %v1664_v23 = vmul.f32 %v3600_v21, %v1616_v20  ;;  %v1744_v43 = vmul.f32 -0.8, %v1616_v20  ;;  %v1315_v51 = vmul.f32 %v1294_v22, %v1219_v25  ;;  %v1443_v47 = vmul.f32 %v1427_v29, %v1294_v22 }
 0x3a9   : > { %v2370_v58 = vpack.c.bf16 %v1616_v20, %v1615_v53  ;;  %v1663_v56 = vmul.f32 %v3602_v9, %v1615_v53  ;;  %v1743_v0 = vmul.f32 -0.8, %v1615_v53 }
 0x3aa   : > { %v1395_v32 = vpop.permute.xlu1 %1394  ;;  %v3606_v8 = vadd.f32 -0.75, %v1664_v23 }
 0x3ab   : > { %v1390_v35 = vpop.permute.xlu0 %1389  ;;  %2371 = vmatprep.subr.bf16.mxu0 %v2370_v58  ;;  %v3608_v62 = vadd.f32 -0.75, %v1663_v56  ;;  %v1412_v17 = vadd.f32 %v1395_v32, %v1316_v39  ;;  %v1460_v50 = vadd.f32 %v1444_v33, %v1395_v32 }
 0x3ac   : > { %v1728_v12 = vmul.f32 %v1696_v42, %v3606_v8  ;;  %2372 = vmatpush3.bf16.msra.mxu0 %v2888_v31  ;;  %v1411_v54 = vadd.f32 %v1390_v35, %v1315_v51  ;;  %v1459_v24 = vadd.f32 %v1443_v47, %v1390_v35 }
 0x3ad   : > { %v1727_v48 = vmul.f32 %v1695_v37, %v3608_v62  ;;  %v2401_v13 = vpack.c.bf16 %v3606_v8, %v3608_v62 }
 0x3ae   : > { %v1524_v52 = vpop.permute.xlu1 %1523  ;;  %v3613_v27 = vadd.f32 %v1744_v43, %v1728_v12 }
 0x3af   : > { %v2634_v4 = vpop.eup %2633  ;;  %v1521_v57 = vpop.permute.xlu0 %1520  ;;  %vm1540_vm8 = vcmp.eq.s32.totalorder %v1524_v52, 1  ;;  %v3615_v60 = vadd.f32 %v1743_v0, %v1727_v48 }
 0x3b0   : > { %v2636_v61 = vpop.eup %2635  ;;  %vm1539_vm9 = vcmp.eq.s32.totalorder %v1521_v57, 1  ;;  %v1556_v63 = vsel %vm1540_vm8, %v1412_v17, %v1460_v50  ;;  %v1586_v49 = vmul.f32 4.0, %v2634_v4  ;;  %v3621_v34 = vmul.f32 1.875, %v2634_v4  ;;  %v1813_v57 = vld [vmem:[#allocation14] sm:$0xff] }
 0x3b1   : > { %v1555_v1 = vsel %vm1539_vm9, %v1411_v54, %v1459_v24  ;;  %2637 = vtanh.f32 %v1556_v63  ;;  %v2399_v44 = vpack.c.bf16 %v3613_v27, %v3615_v60  ;;  %v1585_v7 = vmul.f32 4.0, %v2636_v61 }
 0x3b2   : > { %2639 = vtanh.f32 %v1555_v1  ;;  %v1618_v14 = vmul.f32 0.5, %v1586_v49  ;;  %v3623_v28 = vmul.f32 1.875, %v2636_v61  ;;  %v1698_v53 = vmul.f32 1.8666667, %v2634_v4 }
 0x3b3   : > { %2400 = vmatprep.subr.bf16.mxu1 %v2399_v44  ;;  %v1617_v15 = vmul.f32 0.5, %v1585_v7  ;;  %v1697_v2 = vmul.f32 1.8666667, %v2636_v61  ;;  %v1819_v44 = vld [vmem:[#allocation14 + $0x30] sm:$0xff] }
 0x3b4   : > { %2402 = vmatpush3.bf16.msra.mxu1 %v2401_v13  ;;  %v1666_v18 = vmul.f32 %v3621_v34, %v1618_v14  ;;  %v1746_v58 = vmul.f32 -0.8, %v1618_v14  ;;  %v1771_v13 = vmul.f32 %v3565_v16, %v3543_v36  ;;  %v1817_v16 = vld [vmem:[#allocation14 + $0x20] sm:$0xff] }
 0x3b5   : > { %v2373_v19 = vpack.c.bf16 %v1618_v14, %v1617_v15  ;;  %v1665_v20 = vmul.f32 %v3623_v28, %v1617_v15  ;;  %v1745_v25 = vmul.f32 -0.8, %v1617_v15  ;;  %v1772_v15 = vmul.f32 %v3569_v30, %v3547_v45 }
 0x3b6   : > { %v3627_v22 = vadd.f32 -0.75, %v1666_v18  ;;  %v1818_v18 = vld [vmem:[#allocation14 + $0x28] sm:$0xff]  ;;  %v1773_v45 = vmul.f32 %v3594_v5, %v3578_v26  ;;  %v1790_v30 = vmul.f32 -0.8333333, %v3583_v40  ;;  %v1776_v26 = vmul.f32 %v3613_v27, %v3600_v21  ;;  %v1820_v40 = vld [vmem:[#allocation14 + $0x38] sm:$0xff] }
 0x3b7   : > { %2374 = vmatprep.subr.bf16.mxu0 %v2373_v19  ;;  %v3629_v23 = vadd.f32 -0.75, %v1665_v20  ;;  %v1788_v20 = vmul.f32 -0.8333333, %v3558_v59  ;;  %v1789_v59 = vmul.f32 -0.8333333, %v3585_v10 }
 0x3b8   : > { %v1730_v6 = vmul.f32 %v1698_v53, %v3627_v22  ;;  %2375 = vmatpush3.bf16.msra.mxu0 %v2888_v31  ;;  %v1792_v10 = vmul.f32 -0.8333333, %v3606_v8 }
 0x3b9   : > { %v1729_v56 = vmul.f32 %v1697_v2, %v3629_v23  ;;  %v2405_v12 = vpack.c.bf16 %v3627_v22, %v3629_v23  ;;  %v1804_v2 = vadd.f32 %v1788_v20, %v1772_v15 }
 0x3ba   : > { %v3634_v29 = vadd.f32 %v1746_v58, %v1730_v6  ;;  %v1821_v6 = vld [vmem:[#allocation14 + $0x40] sm:$0xff]  ;;  %v1775_v58 = vmul.f32 %v3615_v60, %v3602_v9 }
 0x3bb   : > { %v2638_v32 = vpop.eup %2637  ;;  %v3636_v42 = vadd.f32 %v1745_v25, %v1729_v56  ;;  %v1808_v25 = vadd.f32 %v1792_v10, %v1776_v26 }
 0x3bc   : > { %v2640_v35 = vpop.eup %2639  ;;  %v1588_v37 = vmul.f32 4.0, %v2638_v32  ;;  %v3642_v51 = vmul.f32 1.875, %v2638_v32  ;;  %v1700_v4 = vmul.f32 1.8666667, %v2638_v32  ;;  %v1778_v21 = vmul.f32 %v3634_v29, %v3621_v34 }
 0x3bd   : > { %v2403_v39 = vpack.c.bf16 %v3634_v29, %v3636_v42  ;;  %v1587_v33 = vmul.f32 4.0, %v2640_v35  ;;  %v3644_v48 = vmul.f32 1.875, %v2640_v35  ;;  %v1699_v24 = vmul.f32 1.8666667, %v2640_v35 }
 0x3be   : > { %v1620_v43 = vmul.f32 0.5, %v1588_v37  ;;  %v1777_v9 = vmul.f32 %v3636_v42, %v3623_v28 }
 0x3bf   : > { %2404 = vmatprep.subr.bf16.mxu1 %v2403_v39  ;;  %v1619_v47 = vmul.f32 0.5, %v1587_v33 }
 0x3c0   : > { %2406 = vmatpush3.bf16.msra.mxu1 %v2405_v12  ;;  %v1668_v0 = vmul.f32 %v3642_v51, %v1620_v43  ;;  %v1748_v63 = vmul.f32 -0.8, %v1620_v43 }
 0x3c1   : > { %v2376_v17 = vpack.c.bf16 %v1620_v43, %v1619_v47  ;;  %v1667_v50 = vmul.f32 %v3644_v48, %v1619_v47  ;;  %v1747_v1 = vmul.f32 -0.8, %v1619_v47 }
 0x3c2   : > { %v3648_v52 = vadd.f32 -0.75, %v1668_v0 }
 0x3c3   : > { %2377 = vmatprep.subr.bf16.mxu0 %v2376_v17  ;;  %v3650_v54 = vadd.f32 -0.75, %v1667_v50 }
 0x3c4   : > { %2378 = vmatpush3.bf16.msra.mxu0 %v2888_v31  ;;  %v1732_v61 = vmul.f32 %v1700_v4, %v3648_v52  ;;  %v1787_v31 = vmul.f32 -0.8333333, %v3556_v55  ;;  %v1815_v55 = vld [vmem:[#allocation14 + $0x10] sm:$0xff]  ;;  %v1796_v34 = vmul.f32 -0.8333333, %v3648_v52 }
 0x3c5   : > { %2412 = vmatprep.subr.bf16.mxu0 %v3554_v41  ;;  %v1731_v49 = vmul.f32 %v1699_v24, %v3650_v54  ;;  %v2409_v53 = vpack.c.bf16 %v3648_v52, %v3650_v54  ;;  %v1795_v28 = vmul.f32 -0.8333333, %v3650_v54 }
 0x3c6   : > { %v1764_v7 = vadd.f32 %v1748_v63, %v1732_v61  ;;  %v1803_v36 = vadd.f32 %v1787_v31, %v1771_v13 }
 0x3c7   : > { %1888 = vmatmul.mubr.f32.vlgmr.msra.gmra.mrb[0].mxu0 %v1813_v57  ;;  %v1763_v14 = vadd.f32 %v1747_v1, %v1731_v49 }
 0x3c8   : > { %2414 = vmatpush3.bf16.msra.mxu0 %v3554_v41  ;;  %1892 = vmatprep.mubr.f32.mxu0 %v1819_v44  ;;  %v1774_v41 = vmul.f32 %v3592_v38, %v3574_v3  ;;  %v2423_v3 = vpack.c.bf16 %v1804_v2, %v1803_v36  ;;  %v1805_v38 = vadd.f32 %v1789_v59, %v1773_v45 }
 0x3c9   : > { %2416 = vmatprep.subr.bf16.mxu0 %v3563_v46  ;;  %v2407_v19 = vpack.c.bf16 %v1764_v7, %v1763_v14  ;;  %v1779_v35 = vmul.f32 %v1763_v14, %v3644_v48  ;;  %v1780_v37 = vmul.f32 %v1764_v7, %v3642_v51 }
 0x3ca   : > { %v1806_v5 = vadd.f32 %v1790_v30, %v1774_v41 }
 0x3cb   : > { %2408 = vmatprep.subr.bf16.mxu1 %v2407_v19  ;;  %1893 = vmatmul.mubr.f32.gmra.mrb[2].mxu0 %v1818_v18  ;;  %v1811_v42 = vadd.f32 %v1795_v28, %v1779_v35  ;;  %v1812_v39 = vadd.f32 %v1796_v34, %v1780_v37 }
 0x3cc   : > { %2410 = vmatpush3.bf16.msra.mxu1 %v2409_v53  ;;  %2418 = vmatpush3.bf16.msra.mxu0 %v3563_v46  ;;  %v1791_v46 = vmul.f32 -0.8333333, %v3608_v62  ;;  %v2427_v32 = vpack.c.bf16 %v1806_v5, %v1805_v38  ;;  %v1794_v62 = vmul.f32 -0.8333333, %v3627_v22  ;;  %v1822_v22 = vld [vmem:[#allocation14 + $0x48] sm:$0xff] }
 0x3cd   : > { %2420 = vmatprep.subr.bf16.mxu0 %v3589_v11  ;;  %2352 = vmatprep.mubr.f32.mxu0 %v1817_v16 }
 0x3ce   : > { %v1807_v56 = vadd.f32 %v1791_v46, %v1775_v58  ;;  %v1810_v60 = vadd.f32 %v1794_v62, %v1778_v21 }
 0x3cf   : > { %1963 = vmatmul.mubr.f32.vlgmr.msra.gmra.mrb[0].mxu1 %v1815_v55 }
 0x3d0   : > { %2422 = vmatpush3.bf16.msra.mxu0 %v3589_v11  ;;  %1967 = vmatprep.mubr.f32.mxu1 %v1821_v6  ;;  %v1793_v11 = vmul.f32 -0.8333333, %v3629_v23  ;;  %v2431_v8 = vpack.c.bf16 %v1808_v25, %v1807_v56  ;;  %v2439_v23 = vpack.c.bf16 %v1812_v39, %v1811_v42 }
 0x3d1   : > { %2424 = vmatprep.subr.bf16.mxu0 %v2423_v3 }
 0x3d2   : > { %v1809_v27 = vadd.f32 %v1793_v11, %v1777_v9 }
 0x3d3   : > { %1968 = vmatmul.mubr.f32.gmra.mrb[2].mxu1 %v1820_v40 }
 0x3d4   : > { %2426 = vmatpush3.bf16.msra.mxu0 %v2423_v3  ;;  %v2435_v29 = vpack.c.bf16 %v1810_v60, %v1809_v27 }
 0x3d5   : > { %2428 = vmatprep.subr.bf16.mxu0 %v2427_v32 }
 0x3d8   : > { %2430 = vmatpush3.bf16.msra.mxu0 %v2427_v32 }
 0x3d9   : > { %2432 = vmatprep.subr.bf16.mxu0 %v2431_v8 }
 0x3dc   : > { %2434 = vmatpush3.bf16.msra.mxu0 %v2431_v8 }
 0x3dd   : > { %2436 = vmatprep.subr.bf16.mxu0 %v2435_v29 }
 0x3e0   : > { %2438 = vmatpush3.bf16.msra.mxu0 %v2435_v29 }
 0x3e1   : > { %2440 = vmatprep.subr.bf16.mxu0 %v2439_v23 }
 0x3e4   : > { %2442 = vmatpush3.bf16.msra.mxu0 %v2439_v23 }
 0x3e7   : > { %2353 = vmatmul.mubr.f32.vlgmr.msra.gmra.mrb[4].mxu0 %v1822_v22 }
 0x49a   : > { %v2238_v33 = vpop.f32.mrb[0].mxu0 }
 0x49b   : > { %v2239_v12 = vpop.f32.mrb[1].mxu0 }
 0x49c   : > { %v2240_v43 = vadd.f32 %v2239_v12, %v2238_v33 }
 0x49e   : > { %v2241_v51 = vpop.f32.mrb[2].mxu0 }
 0x49f   : > { %v2242_v47 = vpop.f32.mrb[3].mxu0 }
 0x4a0   : > { %v2243_v48 = vadd.f32 %v2242_v47, %v2241_v51 }
 0x4a2   : > { %v2276_v0 = vpop.f32.mrb[0].mxu1 }
 0x4a3   : > { %v2277_v17 = vpop.f32.mrb[1].mxu1 }
 0x4a4   : > { %v2278_v50 = vadd.f32 %v2277_v17, %v2276_v0 }
 0x4a6   : > { %v2279_v52 = vpop.f32.mrb[2].mxu1  ;;  %v1965_v4 = vadd.f32 %v2278_v50, %v2240_v43 }
 0x4a7   : > { %v2280_v54 = vpop.f32.mrb[3].mxu1 }
 0x4a8   : > { %v2281_v24 = vadd.f32 %v2280_v54, %v2279_v52 }
 0x4aa   : > { %v1970_v57 = vadd.f32 %v2281_v24, %v2243_v48 }
 0x4ba   : > { %v2354_v61 = vpop.f32.mrb[4].mxu0 }
 0x4bb   : > { %v2045_v63 = vadd.f32 %v2354_v61, %v1970_v57  ;;  %v2039_v49 = vpop.f32.mrb[5].mxu0 }
 0x4bc   : > { %v2040_v1 = vadd.f32 %v2039_v49, %v1965_v4 }
 0x4bd   : > { %2049 = vst.msk [vmem:[#allocation15 + $0x8] sm:$0xff] %vm879_vm7, %v2045_v63 }
 0x4be   : > { %2048 = vst.msk [vmem:[#allocation15] sm:$0xff] %vm879_vm7, %v2040_v1 }
 0x4bf PF: > { %s3761_s21 = sadd.s32 4294967295, %s2871_s23   ;;  %s2889_s26 = smov [#allocation15]  }
 0x4c0   : > { %p3695_p6 = scmp.eq.s32.totalorder %s3761_s21, 1  ;;  %s2056_s29 = sshll.u32 %s2889_s26, 4  ;;  %s2057_s29 = int_to_ptr.vmem [resolvable:$true] %s2056_s29 }
 0x4c1   : > { %s2783_s13 = scalar_lea.vmem %s2057_s29, 256  ;;  %p2790_p11 = scmp.lt.s32.totalorder %s2057_s29, %s2057_s29 }
 0x4c2   : > { %p2784_p8 = scmp.ne.s32.totalorder %s2057_s29, %s2783_s13  ;;  %p2791_p13 = scmp.lt.s32.totalorder %s2783_s13, %s2783_s13 }
 0x4c4   : > { %p2785_p9 = pnand %p2784_p8, %p3695_p6  ;;  %p2792_p2 = por %p2791_p13, %p2790_p11 }
 0x4c6   : > { %p2786_p5 = pneg %p2785_p9 }
 0x4c8   : > { %p2793_p7 = pnand %p2792_p2, %p2786_p5 }
 0x4ca   : > { %2796 = shalt.err (!%p2793_p7)
}
 0x4cb   : > { %s2797_s12 = scalar_lea.hbm %s3744_s5, 256 }
 0x4cc   : > { %p2798_p1 = scmp.ne.s32.totalorder %s3744_s5, %s2797_s12  ;;  %p2803_p0 = scmp.lt.u32.totalorder %s2797_s12, %s3744_s5 }
 0x4ce   : > { %p2799_p3 = pnand %p2798_p1, %p3695_p6 }
 0x4d0   : > { %p2800_p4 = pneg %p2799_p3 }
 0x4d2   : > { %p2805_p12 = pnand %p2803_p0, %p2800_p4 }
 0x4d4   : > { %2808 = shalt.err (!%p2805_p12)
}
 0x4d5   : > { %s2890_s18 = smov 128   ;;  %s2891_s10 = smov 8  }
 0x4d6   : > { %2468 = dma.vmem_to_hbm [thread:$0]  (%p3695_p6), %s2057_s29, 256, %s3744_s5, [#allocation8], %s2890_s18, %s2890_s18, %s2891_s10  }
 0x4d7   : > { %2846 = dma.done.wait (%p3695_p6), [#allocation8], 256  }
 0x4d8   : > { %2848 = vsyncadd (%p3695_p6), [#allocation8], 4294967040 }
 0x4d9 PF: > { %s21_s23 = sadd.s32 1, %s2871_s23   ;;  %s3763_s18 = smov %s2855_s19 }
 0x4da   : > { %p18_p10 = scmp.ge.s32.totalorder %s21_s23, 4   ;;  %s3764_s19 = smov %s2859_s20 }
 0x4db   : > { %s3765_s20 = smov %s3075_s9  ;;  %s3766_s21 = smov %s2867_s22 }
 0x4dc   : > { %s3767_s22 = smov %s3769_s6  ;;  %20 = sbr.rel (!%p18_p10) target bundleno = 7 (0x7), region = 101 }
 0x4e3   :  { %2072 = vsyncpa [#allocation7], 1 }
 0x4e4   :  { %2074 = vsyncpa [#allocation7 + $0x1], 1 }
 0x4e5   :  { %2075 = vsyncpa [#allocation10], 1 }
 0x4e6   :  { %2076 = vsyncpa [#allocation13], 1 }
 0x4e7   :  { %2077 = vsyncpa [#allocation8], 1 }
 0x4e8   :  { %2079 = vsyncpa [#allocation8 + $0x1], 1 }

</bundles_post_ra>
